<compile_context>
chip_gen: v6e
topology: v6e:2x2x1
jax: 0.10.0
libtpu: 0.0.40
codegen_flags: <defaults>
</compile_context>

<pallas_src>
import functools

import jax
import jax.numpy as jnp
from jax import lax
from jax.experimental import pallas as pl
from jax.experimental.pallas import tpu as pltpu

LN_EPS = 1e-5


def _round_up(x, m):
    return ((x + m - 1) // m) * m


def _vmem_limit_bytes():
    try:
        return int(pltpu.get_tpu_info().vmem_capacity_bytes * 3 // 4)
    except Exception:
        return 48 * 1024 * 1024


# ----------------------------------------------------------------------------
# Fused kernel: one grid step = (one batch tile, one transformer layer).
# The activation for that batch tile lives in VMEM scratch across layers.
# ----------------------------------------------------------------------------
def _transformer_kernel(x_ref,
                        g1_ref, b1_ref,
                        wqkv_ref, wo_ref, bo_ref,
                        g2_ref, b2_ref,
                        w1_ref, bb1_ref, w2_ref, bb2_ref,
                        gf_ref, bf_ref,
                        o_ref, acc_ref, *,
                        d_real, heads, dim_head, inner, inner_p):
    layer = pl.program_id(1)
    rows, dp = acc_ref.shape

    # mask selecting the real (unpadded) feature lanes
    lane = lax.broadcasted_iota(jnp.int32, (1, dp), 1)
    mask = (lane < d_real).astype(jnp.float32)
    inv_d = 1.0 / d_real

    def layernorm(v, gamma, beta):
        # v: (rows, dp) f32 with padded lanes exactly zero; stats on real lanes
        mean = jnp.sum(v, axis=-1, keepdims=True) * inv_d
        diff = (v - mean) * mask
        var = jnp.sum(diff * diff, axis=-1, keepdims=True) * inv_d
        return diff * lax.rsqrt(var + LN_EPS) * gamma + beta

    # first layer for this batch tile: load activation into resident scratch
    @pl.when(layer == 0)
    def _():
        acc_ref[...] = x_ref[...].reshape(rows, dp)

    x = acc_ref[...]                                             # (rows, dp) f32

    # ---------------- PreNorm(Attention) + residual ----------------
    xn = layernorm(x, g1_ref[0], b1_ref[0]).astype(jnp.bfloat16)

    # fused Q/K/V projection: one wide lane-dense bf16 matmul (scale in Wq)
    qkv = jnp.dot(xn, wqkv_ref[0], preferred_element_type=jnp.float32)

    def split_heads(t):                                          # (rows, inner)
        return jnp.swapaxes(t.reshape(rows, heads, dim_head), 0, 1)  # (h, rows, dh)

    qh = split_heads(qkv[:, 0:inner]).astype(jnp.bfloat16)
    kh = split_heads(qkv[:, inner_p:inner_p + inner]).astype(jnp.bfloat16)
    vh = split_heads(qkv[:, 2 * inner_p:2 * inner_p + inner]).astype(jnp.bfloat16)

    dots = jnp.einsum('hid,hjd->hij', qh, kh,
                      preferred_element_type=jnp.float32)        # (h, rows, rows)
    dots = dots - jnp.max(dots, axis=-1, keepdims=True)
    p = jnp.exp(dots)
    attn = p * pl.reciprocal(jnp.sum(p, axis=-1, keepdims=True), approx=True)

    ctx = jnp.einsum('hij,hjd->hid', attn.astype(jnp.bfloat16), vh,
                     preferred_element_type=jnp.float32)         # (h, rows, dh)
    ctx = jnp.swapaxes(ctx, 0, 1).reshape(rows, inner).astype(jnp.bfloat16)

    # output projection: head reduction folded into the MXU contraction
    wo = wo_ref[0]
    if inner != inner_p:
        wo = wo[:inner]
    x = jnp.dot(ctx, wo, preferred_element_type=jnp.float32) + bo_ref[0] + x

    # ---------------- PreNorm(FeedForward) + residual ----------------
    xn = layernorm(x, g2_ref[0], b2_ref[0]).astype(jnp.bfloat16)
    h = jnp.dot(xn, w1_ref[0], preferred_element_type=jnp.float32) + bb1_ref[0]
    # exact (erf) GELU, matching torch.nn.GELU default
    h = 0.5 * h * (1.0 + lax.erf(h * 0.7071067811865476))
    x = jnp.dot(h.astype(jnp.bfloat16), w2_ref[0],
                preferred_element_type=jnp.float32) + bb2_ref[0] + x

    acc_ref[...] = x

    # last layer: apply final LayerNorm and emit the output block
    @pl.when(layer == pl.num_programs(1) - 1)
    def _():
        o_ref[...] = layernorm(x, gf_ref[...], bf_ref[...]).reshape(o_ref.shape)


# ----------------------------------------------------------------------------
# parameter init (PyTorch-layout, unpadded) + packing into padded bf16 stacks
# ----------------------------------------------------------------------------
def init_params(key, dim, depth, heads, dim_head, mlp_dim):
    inner = heads * dim_head
    params = {"layers": [],
              "final_ln_g": jnp.ones((1, dim), jnp.float32),
              "final_ln_b": jnp.zeros((1, dim), jnp.float32)}
    for _ in range(depth):
        key, *ks = jax.random.split(key, 6)
        layer = {
            "attn_ln_g": jnp.ones((1, dim), jnp.float32),
            "attn_ln_b": jnp.zeros((1, dim), jnp.float32),
            "wq": jax.random.normal(ks[0], (dim, inner), jnp.float32) * 0.02,
            "wkv": jax.random.normal(ks[1], (dim, 2 * inner), jnp.float32) * 0.02,
            "wo": jax.random.normal(ks[2], (inner, dim), jnp.float32) * 0.02,
            "bo": jnp.zeros((1, dim), jnp.float32),
            "ff_ln_g": jnp.ones((1, dim), jnp.float32),
            "ff_ln_b": jnp.zeros((1, dim), jnp.float32),
            "w1": jax.random.normal(ks[3], (dim, mlp_dim), jnp.float32) * 0.02,
            "b1": jnp.zeros((1, mlp_dim), jnp.float32),
            "w2": jax.random.normal(ks[4], (mlp_dim, dim), jnp.float32) * 0.02,
            "b2": jnp.zeros((1, dim), jnp.float32),
        }
        params["layers"].append(layer)
    return params


def pack_params(params, *, dim, heads, dim_head, mlp_dim):
    """Zero-pad to lane-dense sizes, fuse Q/K/V into one wide matrix (Q scale
    folded in), cast matmul weights to bf16, stack along a leading depth axis."""
    inner = heads * dim_head
    DP = _round_up(dim, 128)
    IP = _round_up(inner, 128)
    HP = _round_up(mlp_dim, 128)
    scale = dim_head ** (-0.5)

    def pad2(a, rows, cols):
        return jnp.zeros((rows, cols), jnp.float32).at[:a.shape[0], :a.shape[1]].set(a)

    keys = ("ln1_g", "ln1_b", "wqkv", "wo", "bo", "ln2_g", "ln2_b",
            "w1", "b1", "w2", "b2")
    acc = {k: [] for k in keys}
    for layer in params["layers"]:
        wq = layer["wq"] * scale                 # fold 1/sqrt(dim_head) into Q
        wk = layer["wkv"][:, :inner]
        wv = layer["wkv"][:, inner:]
        wqkv = jnp.zeros((DP, 3 * IP), jnp.float32)
        wqkv = wqkv.at[:dim, 0:inner].set(wq)
        wqkv = wqkv.at[:dim, IP:IP + inner].set(wk)
        wqkv = wqkv.at[:dim, 2 * IP:2 * IP + inner].set(wv)

        acc["ln1_g"].append(pad2(layer["attn_ln_g"], 1, DP))
        acc["ln1_b"].append(pad2(layer["attn_ln_b"], 1, DP))
        acc["wqkv"].append(wqkv)
        acc["wo"].append(pad2(layer["wo"], IP, DP))
        acc["bo"].append(pad2(layer["bo"], 1, DP))
        acc["ln2_g"].append(pad2(layer["ff_ln_g"], 1, DP))
        acc["ln2_b"].append(pad2(layer["ff_ln_b"], 1, DP))
        acc["w1"].append(pad2(layer["w1"], DP, HP))
        acc["b1"].append(pad2(layer["b1"], 1, HP))
        acc["w2"].append(pad2(layer["w2"], HP, DP))
        acc["b2"].append(pad2(layer["b2"], 1, DP))

    packed = {k: jnp.stack(v) for k, v in acc.items()}
    for k in ("wqkv", "wo", "w1", "w2"):        # bf16 weights, zero pad preserved
        packed[k] = packed[k].astype(jnp.bfloat16)
    packed["lnf_g"] = pad2(params["final_ln_g"], 1, DP)
    packed["lnf_b"] = pad2(params["final_ln_b"], 1, DP)
    return packed


# ----------------------------------------------------------------------------
# full-model forward: one fused pallas_call
# ----------------------------------------------------------------------------
def transformer_forward(x, packed, *, dim, heads, dim_head):
    B, N, _ = x.shape
    depth = packed["wqkv"].shape[0]
    DP = packed["w1"].shape[1]
    HP = packed["w1"].shape[2]
    IP = packed["wo"].shape[1]
    inner = heads * dim_head

    # Batch tiling: 2 tiles keeps both v7x TensorCores busy while limiting the
    # per-layer weight re-fetch to 2x (instead of Bx); 1 tile for odd batches.
    bt = 2 if (B % 2 == 0 and B >= 2) else 1
    b_tile = B // bt
    rows = b_tile * N

    x_p = jnp.zeros((B, N, DP), jnp.float32).at[:, :, :dim].set(x)

    kernel = functools.partial(_transformer_kernel, d_real=dim, heads=heads,
                               dim_head=dim_head, inner=inner, inner_p=IP)

    def per_layer(shape):
        nd = len(shape)
        return pl.BlockSpec(shape, lambda b, l, _nd=nd: (l,) + (0,) * (_nd - 1))

    out = pl.pallas_call(
        kernel,
        out_shape=jax.ShapeDtypeStruct((B, N, DP), jnp.float32),
        grid=(bt, depth),
        in_specs=[
            pl.BlockSpec((b_tile, N, DP), lambda b, l: (b, 0, 0)),   # x
            per_layer((1, 1, DP)), per_layer((1, 1, DP)),            # attn LN g/b
            per_layer((1, DP, 3 * IP)),                              # fused Wqkv (bf16)
            per_layer((1, IP, DP)),                                  # Wo (bf16)
            per_layer((1, 1, DP)),                                   # bo
            per_layer((1, 1, DP)), per_layer((1, 1, DP)),            # ff LN g/b
            per_layer((1, DP, HP)), per_layer((1, 1, HP)),           # W1, b1
            per_layer((1, HP, DP)), per_layer((1, 1, DP)),           # W2, b2
            pl.BlockSpec((1, DP), lambda b, l: (0, 0)),              # final LN g
            pl.BlockSpec((1, DP), lambda b, l: (0, 0)),              # final LN b
        ],
        out_specs=pl.BlockSpec((b_tile, N, DP), lambda b, l: (b, 0, 0)),
        scratch_shapes=[pltpu.VMEM((rows, DP), jnp.float32)],
        compiler_params=pltpu.CompilerParams(
            dimension_semantics=("parallel", "arbitrary"),
            vmem_limit_bytes=_vmem_limit_bytes()),
    )(x_p,
      packed["ln1_g"], packed["ln1_b"],
      packed["wqkv"], packed["wo"], packed["bo"],
      packed["ln2_g"], packed["ln2_b"],
      packed["w1"], packed["b1"], packed["w2"], packed["b2"],
      packed["lnf_g"], packed["lnf_b"])

    return out[:, :, :dim]


# ----------------------------------------------------------------------------
# pure-JAX reference (unpadded, f32, exact softmax divide)
# ----------------------------------------------------------------------------
def _ref_ln(x, g, b):
    mean = jnp.mean(x, axis=-1, keepdims=True)
    var = jnp.mean(jnp.square(x - mean), axis=-1, keepdims=True)
    return (x - mean) / jnp.sqrt(var + LN_EPS) * g + b


def ref_forward(x, params, *, heads, dim_head):
    inner = heads * dim_head
    scale = dim_head ** (-0.5)
    for layer in params["layers"]:
        xn = _ref_ln(x, layer["attn_ln_g"], layer["attn_ln_b"])
        q = xn @ layer["wq"]
        kv = xn @ layer["wkv"]
        k, v = kv[..., :inner], kv[..., inner:]
        b_, n_, _ = q.shape

        def split(t):
            return jnp.transpose(t.reshape(b_, n_, heads, dim_head), (0, 2, 1, 3))
        qh, kh, vh = split(q), split(k), split(v)
        dots = jnp.einsum("bhid,bhjd->bhij", qh, kh) * scale
        attn = jax.nn.softmax(dots, axis=-1)
        out = jnp.einsum("bhij,bhjd->bhid", attn, vh)
        out = jnp.transpose(out, (0, 2, 1, 3)).reshape(b_, n_, inner)
        x = out @ layer["wo"] + layer["bo"] + x

        xn = _ref_ln(x, layer["ff_ln_g"], layer["ff_ln_b"])
        h = xn @ layer["w1"] + layer["b1"]
        h = 0.5 * h * (1.0 + lax.erf(h / jnp.sqrt(2.0)))
        x = h @ layer["w2"] + layer["b2"] + x
    return _ref_ln(x, params["final_ln_g"], params["final_ln_b"])


if __name__ == "__main__":
    # Small config: dim=32, depth=2, heads=4, dim_head=8, mlp_dim=64
    batch, seq, dim = 2, 8, 32
    depth, heads, dim_head, mlp_dim = 2, 4, 8, 64

    key = jax.random.PRNGKey(0)
    kx, kp = jax.random.split(key)
    x = jax.random.normal(kx, (batch, seq, dim), jnp.float32)
    params = init_params(kp, dim, depth, heads, dim_head, mlp_dim)
    packed = pack_params(params, dim=dim, heads=heads, dim_head=dim_head,
                         mlp_dim=mlp_dim)

    out = transformer_forward(x, packed, dim=dim, heads=heads, dim_head=dim_head)
    out = jax.block_until_ready(out)

    ref = jax.block_until_ready(ref_forward(x, params, heads=heads, dim_head=dim_head))
    assert out.shape == (batch, seq, dim)
    # bf16 MXU matmuls + pl.reciprocal(approx=True) softmax vs f32 reference:
    # observed drift is well below 1e-2 at these scales.
    assert jnp.allclose(out, ref, atol=1e-2, rtol=1e-2), "mismatch vs reference"

    print("KERNEL_OK")
</pallas_src>

<mosaic_0001>
module attributes {stable_mosaic.version = 11 : i64} {
  func.func @_transformer_kernel(%arg0: i32, %arg1: i32, %arg2: memref<1x8x128xf32, #tpu.memory_space<vmem>>, %arg3: memref<1x1x128xf32, #tpu.memory_space<vmem>>, %arg4: memref<1x1x128xf32, #tpu.memory_space<vmem>>, %arg5: memref<1x128x384xbf16, #tpu.memory_space<vmem>>, %arg6: memref<1x128x128xbf16, #tpu.memory_space<vmem>>, %arg7: memref<1x1x128xf32, #tpu.memory_space<vmem>>, %arg8: memref<1x1x128xf32, #tpu.memory_space<vmem>>, %arg9: memref<1x1x128xf32, #tpu.memory_space<vmem>>, %arg10: memref<1x128x128xbf16, #tpu.memory_space<vmem>>, %arg11: memref<1x1x128xf32, #tpu.memory_space<vmem>>, %arg12: memref<1x128x128xbf16, #tpu.memory_space<vmem>>, %arg13: memref<1x1x128xf32, #tpu.memory_space<vmem>>, %arg14: memref<1x128xf32, #tpu.memory_space<vmem>>, %arg15: memref<1x128xf32, #tpu.memory_space<vmem>>, %arg16: memref<1x8x128xf32, #tpu.memory_space<vmem>>, %arg17: memref<8x128xf32, #tpu.memory_space<vmem>>) attributes {dimension_semantics = [#tpu.dimension_semantics<parallel>, #tpu.dimension_semantics<arbitrary>], iteration_bounds = array<i64: 2, 2>, scalar_prefetch = 0 : i64, scratch_operands = 1 : i64, tpu.core_type = #tpu.core_type<tc>, window_params = [{transform_indices = @transform_0, window_bounds = array<i64: 1, 8, 128>}, {transform_indices = @transform_1, window_bounds = array<i64: 1, 1, 128>}, {transform_indices = @transform_2, window_bounds = array<i64: 1, 1, 128>}, {transform_indices = @transform_3, window_bounds = array<i64: 1, 128, 384>}, {transform_indices = @transform_4, window_bounds = array<i64: 1, 128, 128>}, {transform_indices = @transform_5, window_bounds = array<i64: 1, 1, 128>}, {transform_indices = @transform_6, window_bounds = array<i64: 1, 1, 128>}, {transform_indices = @transform_7, window_bounds = array<i64: 1, 1, 128>}, {transform_indices = @transform_8, window_bounds = array<i64: 1, 128, 128>}, {transform_indices = @transform_9, window_bounds = array<i64: 1, 1, 128>}, {transform_indices = @transform_10, window_bounds = array<i64: 1, 128, 128>}, {transform_indices = @transform_11, window_bounds = array<i64: 1, 1, 128>}, {pipeline_mode = #tpu.pipeline_mode<synchronous>, transform_indices = @transform_12, window_bounds = array<i64: 1, 128>}, {pipeline_mode = #tpu.pipeline_mode<synchronous>, transform_indices = @transform_13, window_bounds = array<i64: 1, 128>}, {transform_indices = @transform_14, window_bounds = array<i64: 1, 8, 128>}]} {
    %0 = tpu.iota {dimensions = array<i32: 1>} : vector<1x128xi32>
    %c32_i32 = arith.constant 32 : i32
    %1 = vector.broadcast %c32_i32 : i32 to vector<1x128xi32>
    %2 = arith.cmpi slt, %0, %1 : vector<1x128xi32>
    %3 = arith.extui %2 : vector<1x128xi1> to vector<1x128xi32>
    %4 = arith.sitofp %3 : vector<1x128xi32> to vector<1x128xf32>
    %c0_i32 = arith.constant 0 : i32
    %5 = arith.cmpi eq, %arg1, %c0_i32 : i32
    %6 = arith.extui %5 : i1 to i32
    %c0_i32_0 = arith.constant 0 : i32
    %7 = arith.cmpi ne, %6, %c0_i32_0 : i32
    scf.if %7 {
      %c0_58 = arith.constant 0 : index
      %c0_59 = arith.constant 0 : index
      %c0_60 = arith.constant 0 : index
      %131 = vector.load %arg2[%c0_58, %c0_59, %c0_60] : memref<1x8x128xf32, #tpu.memory_space<vmem>>, vector<1x8x128xf32>
      %132 = vector.shape_cast %131 : vector<1x8x128xf32> to vector<8x128xf32>
      %c0_61 = arith.constant 0 : index
      %c0_62 = arith.constant 0 : index
      %133 = vector.load %arg17[%c0_61, %c0_62] : memref<8x128xf32, #tpu.memory_space<vmem>>, vector<8x128xf32>
      tpu.vector_store %arg17[%c0_61, %c0_62], %132 {strides = array<i32>} : memref<8x128xf32, #tpu.memory_space<vmem>>, vector<8x128xf32>,
    } else {
    }
    %c0 = arith.constant 0 : index
    %c0_1 = arith.constant 0 : index
    %8 = vector.load %arg17[%c0, %c0_1] : memref<8x128xf32, #tpu.memory_space<vmem>>, vector<8x128xf32>
    %c0_2 = arith.constant 0 : index
    %c0_3 = arith.constant 0 : index
    %c0_4 = arith.constant 0 : index
    %9 = vector.load %arg3[%c0_2, %c0_3, %c0_4] : memref<1x1x128xf32, #tpu.memory_space<vmem>>, vector<1x1x128xf32>
    %10 = vector.shape_cast %9 : vector<1x1x128xf32> to vector<1x128xf32>
    %c0_5 = arith.constant 0 : index
    %c0_6 = arith.constant 0 : index
    %c0_7 = arith.constant 0 : index
    %11 = vector.load %arg4[%c0_5, %c0_6, %c0_7] : memref<1x1x128xf32, #tpu.memory_space<vmem>>, vector<1x1x128xf32>
    %12 = vector.shape_cast %11 : vector<1x1x128xf32> to vector<1x128xf32>
    %cst = arith.constant dense<0.000000e+00> : vector<8xf32>
    %13 = vector.multi_reduction <add>, %8, %cst [1] : vector<8x128xf32> to vector<8xf32>
    %14 = vector.shape_cast %13 : vector<8xf32> to vector<8x1xf32>
    %cst_8 = arith.constant 3.125000e-02 : f32
    %15 = vector.broadcast %cst_8 : f32 to vector<8x1xf32>
    %16 = arith.mulf %14, %15 : vector<8x1xf32>
    %17 = vector.broadcast %16 : vector<8x1xf32> to vector<8x128xf32>
    %18 = arith.subf %8, %17 : vector<8x128xf32>
    %19 = vector.broadcast %4 : vector<1x128xf32> to vector<8x128xf32>
    %20 = arith.mulf %18, %19 : vector<8x128xf32>
    %21 = arith.mulf %20, %20 : vector<8x128xf32>
    %cst_9 = arith.constant dense<0.000000e+00> : vector<8xf32>
    %22 = vector.multi_reduction <add>, %21, %cst_9 [1] : vector<8x128xf32> to vector<8xf32>
    %23 = vector.shape_cast %22 : vector<8xf32> to vector<8x1xf32>
    %cst_10 = arith.constant 3.125000e-02 : f32
    %24 = vector.broadcast %cst_10 : f32 to vector<8x1xf32>
    %25 = arith.mulf %23, %24 : vector<8x1xf32>
    %cst_11 = arith.constant 9.99999974E-6 : f32
    %26 = vector.broadcast %cst_11 : f32 to vector<8x1xf32>
    %27 = arith.addf %25, %26 : vector<8x1xf32>
    %28 = math.rsqrt %27 : vector<8x1xf32>
    %29 = vector.broadcast %28 : vector<8x1xf32> to vector<8x128xf32>
    %30 = arith.mulf %20, %29 : vector<8x128xf32>
    %31 = vector.broadcast %10 : vector<1x128xf32> to vector<8x128xf32>
    %32 = arith.mulf %30, %31 : vector<8x128xf32>
    %33 = vector.broadcast %12 : vector<1x128xf32> to vector<8x128xf32>
    %34 = arith.addf %32, %33 : vector<8x128xf32>
    %35 = arith.truncf %34 : vector<8x128xf32> to vector<8x128xbf16>
    %c0_12 = arith.constant 0 : index
    %c0_13 = arith.constant 0 : index
    %c0_14 = arith.constant 0 : index
    %36 = vector.load %arg5[%c0_12, %c0_13, %c0_14] : memref<1x128x384xbf16, #tpu.memory_space<vmem>>, vector<1x128x384xbf16>
    %37 = vector.shape_cast %36 : vector<1x128x384xbf16> to vector<128x384xbf16>
    %cst_15 = arith.constant dense<0.000000e+00> : vector<8x384xf32>
    %38 = tpu.matmul %35, %37, %cst_15 {dimension_numbers = #tpu.dot_dimension_numbers<[1], [0], [0], [1], [0, 0, 1, 1], [], []>} : vector<8x128xbf16>, vector<128x384xbf16>, vector<8x384xf32> -> vector<8x384xf32>
    %39 = vector.extract_strided_slice %38 {offsets = [0, 0], sizes = [8, 32], strides = [1, 1]} : vector<8x384xf32> to vector<8x32xf32>
    %40 = vector.shape_cast %39 : vector<8x32xf32> to vector<8x4x8xf32>
    %41 = tpu.transpose %40, [1, 0, 2] : vector<8x4x8xf32> -> vector<4x8x8xf32>
    %42 = arith.truncf %41 : vector<4x8x8xf32> to vector<4x8x8xbf16>
    %43 = vector.extract_strided_slice %38 {offsets = [0, 128], sizes = [8, 32], strides = [1, 1]} : vector<8x384xf32> to vector<8x32xf32>
    %44 = vector.shape_cast %43 : vector<8x32xf32> to vector<8x4x8xf32>
    %45 = tpu.transpose %44, [1, 0, 2] : vector<8x4x8xf32> -> vector<4x8x8xf32>
    %46 = arith.truncf %45 : vector<4x8x8xf32> to vector<4x8x8xbf16>
    %47 = vector.extract_strided_slice %38 {offsets = [0, 256], sizes = [8, 32], strides = [1, 1]} : vector<8x384xf32> to vector<8x32xf32>
    %48 = vector.shape_cast %47 : vector<8x32xf32> to vector<8x4x8xf32>
    %49 = tpu.transpose %48, [1, 0, 2] : vector<8x4x8xf32> -> vector<4x8x8xf32>
    %50 = arith.truncf %49 : vector<4x8x8xf32> to vector<4x8x8xbf16>
    "tpu.trace_start"() <{level = 10 : i32, message = "hid,hjd->hij"}> : () -> ()
    %cst_16 = arith.constant dense<0.000000e+00> : vector<4x8x8xf32>
    %51 = tpu.matmul %42, %46, %cst_16 {dimension_numbers = #tpu.dot_dimension_numbers<[2], [2], [1], [1], [0, 0, 0, 1, 1, 1], [0], [0]>} : vector<4x8x8xbf16>, vector<4x8x8xbf16>, vector<4x8x8xf32> -> vector<4x8x8xf32>
    "tpu.trace_stop"() : () -> ()
    %cst_17 = arith.constant dense<0xFF800000> : vector<4x8xf32>
    %52 = vector.multi_reduction <maximumf>, %51, %cst_17 [2] : vector<4x8x8xf32> to vector<4x8xf32>
    %53 = vector.shape_cast %52 : vector<4x8xf32> to vector<4x8x1xf32>
    %54 = vector.broadcast %53 : vector<4x8x1xf32> to vector<4x8x8xf32>
    %55 = arith.subf %51, %54 : vector<4x8x8xf32>
    %56 = math.exp %55 : vector<4x8x8xf32>
    %cst_18 = arith.constant dense<0.000000e+00> : vector<4x8xf32>
    %57 = vector.multi_reduction <add>, %56, %cst_18 [2] : vector<4x8x8xf32> to vector<4x8xf32>
    %58 = vector.shape_cast %57 : vector<4x8xf32> to vector<4x8x1xf32>
    %59 = tpu.reciprocal %58 {approx = true} : vector<4x8x1xf32> -> vector<4x8x1xf32>
    %60 = vector.broadcast %59 : vector<4x8x1xf32> to vector<4x8x8xf32>
    %61 = arith.mulf %56, %60 : vector<4x8x8xf32>
    %62 = arith.truncf %61 : vector<4x8x8xf32> to vector<4x8x8xbf16>
    "tpu.trace_start"() <{level = 10 : i32, message = "hij,hjd->hid"}> : () -> ()
    %cst_19 = arith.constant dense<0.000000e+00> : vector<4x8x8xf32>
    %63 = tpu.matmul %62, %50, %cst_19 {dimension_numbers = #tpu.dot_dimension_numbers<[2], [1], [1], [2], [0, 0, 0, 1, 1, 2], [0], [0]>} : vector<4x8x8xbf16>, vector<4x8x8xbf16>, vector<4x8x8xf32> -> vector<4x8x8xf32>
    "tpu.trace_stop"() : () -> ()
    %64 = tpu.transpose %63, [1, 0, 2] : vector<4x8x8xf32> -> vector<8x4x8xf32>
    %65 = vector.shape_cast %64 : vector<8x4x8xf32> to vector<8x32xf32>
    %66 = arith.truncf %65 : vector<8x32xf32> to vector<8x32xbf16>
    %c0_20 = arith.constant 0 : index
    %c0_21 = arith.constant 0 : index
    %c0_22 = arith.constant 0 : index
    %67 = vector.load %arg6[%c0_20, %c0_21, %c0_22] : memref<1x128x128xbf16, #tpu.memory_space<vmem>>, vector<1x128x128xbf16>
    %68 = vector.shape_cast %67 : vector<1x128x128xbf16> to vector<128x128xbf16>
    %69 = vector.extract_strided_slice %68 {offsets = [0, 0], sizes = [32, 128], strides = [1, 1]} : vector<128x128xbf16> to vector<32x128xbf16>
    %cst_23 = arith.constant dense<0.000000e+00> : vector<8x128xf32>
    %70 = tpu.matmul %66, %69, %cst_23 {dimension_numbers = #tpu.dot_dimension_numbers<[1], [0], [0], [1], [0, 0, 1, 1], [], []>} : vector<8x32xbf16>, vector<32x128xbf16>, vector<8x128xf32> -> vector<8x128xf32>
    %c0_24 = arith.constant 0 : index
    %c0_25 = arith.constant 0 : index
    %c0_26 = arith.constant 0 : index
    %71 = vector.load %arg7[%c0_24, %c0_25, %c0_26] : memref<1x1x128xf32, #tpu.memory_space<vmem>>, vector<1x1x128xf32>
    %72 = vector.shape_cast %71 : vector<1x1x128xf32> to vector<1x128xf32>
    %73 = vector.broadcast %72 : vector<1x128xf32> to vector<8x128xf32>
    %74 = arith.addf %70, %73 : vector<8x128xf32>
    %75 = arith.addf %74, %8 : vector<8x128xf32>
    %c0_27 = arith.constant 0 : index
    %c0_28 = arith.constant 0 : index
    %c0_29 = arith.constant 0 : index
    %76 = vector.load %arg8[%c0_27, %c0_28, %c0_29] : memref<1x1x128xf32, #tpu.memory_space<vmem>>, vector<1x1x128xf32>
    %77 = vector.shape_cast %76 : vector<1x1x128xf32> to vector<1x128xf32>
    %c0_30 = arith.constant 0 : index
    %c0_31 = arith.constant 0 : index
    %c0_32 = arith.constant 0 : index
    %78 = vector.load %arg9[%c0_30, %c0_31, %c0_32] : memref<1x1x128xf32, #tpu.memory_space<vmem>>, vector<1x1x128xf32>
    %79 = vector.shape_cast %78 : vector<1x1x128xf32> to vector<1x128xf32>
    %cst_33 = arith.constant dense<0.000000e+00> : vector<8xf32>
    %80 = vector.multi_reduction <add>, %75, %cst_33 [1] : vector<8x128xf32> to vector<8xf32>
    %81 = vector.shape_cast %80 : vector<8xf32> to vector<8x1xf32>
    %cst_34 = arith.constant 3.125000e-02 : f32
    %82 = vector.broadcast %cst_34 : f32 to vector<8x1xf32>
    %83 = arith.mulf %81, %82 : vector<8x1xf32>
    %84 = vector.broadcast %83 : vector<8x1xf32> to vector<8x128xf32>
    %85 = arith.subf %75, %84 : vector<8x128xf32>
    %86 = vector.broadcast %4 : vector<1x128xf32> to vector<8x128xf32>
    %87 = arith.mulf %85, %86 : vector<8x128xf32>
    %88 = arith.mulf %87, %87 : vector<8x128xf32>
    %cst_35 = arith.constant dense<0.000000e+00> : vector<8xf32>
    %89 = vector.multi_reduction <add>, %88, %cst_35 [1] : vector<8x128xf32> to vector<8xf32>
    %90 = vector.shape_cast %89 : vector<8xf32> to vector<8x1xf32>
    %cst_36 = arith.constant 3.125000e-02 : f32
    %91 = vector.broadcast %cst_36 : f32 to vector<8x1xf32>
    %92 = arith.mulf %90, %91 : vector<8x1xf32>
    %cst_37 = arith.constant 9.99999974E-6 : f32
    %93 = vector.broadcast %cst_37 : f32 to vector<8x1xf32>
    %94 = arith.addf %92, %93 : vector<8x1xf32>
    %95 = math.rsqrt %94 : vector<8x1xf32>
    %96 = vector.broadcast %95 : vector<8x1xf32> to vector<8x128xf32>
    %97 = arith.mulf %87, %96 : vector<8x128xf32>
    %98 = vector.broadcast %77 : vector<1x128xf32> to vector<8x128xf32>
    %99 = arith.mulf %97, %98 : vector<8x128xf32>
    %100 = vector.broadcast %79 : vector<1x128xf32> to vector<8x128xf32>
    %101 = arith.addf %99, %100 : vector<8x128xf32>
    %102 = arith.truncf %101 : vector<8x128xf32> to vector<8x128xbf16>
    %c0_38 = arith.constant 0 : index
    %c0_39 = arith.constant 0 : index
    %c0_40 = arith.constant 0 : index
    %103 = vector.load %arg10[%c0_38, %c0_39, %c0_40] : memref<1x128x128xbf16, #tpu.memory_space<vmem>>, vector<1x128x128xbf16>
    %104 = vector.shape_cast %103 : vector<1x128x128xbf16> to vector<128x128xbf16>
    %cst_41 = arith.constant dense<0.000000e+00> : vector<8x128xf32>
    %105 = tpu.matmul %102, %104, %cst_41 {dimension_numbers = #tpu.dot_dimension_numbers<[1], [0], [0], [1], [0, 0, 1, 1], [], []>} : vector<8x128xbf16>, vector<128x128xbf16>, vector<8x128xf32> -> vector<8x128xf32>
    %c0_42 = arith.constant 0 : index
    %c0_43 = arith.constant 0 : index
    %c0_44 = arith.constant 0 : index
    %106 = vector.load %arg11[%c0_42, %c0_43, %c0_44] : memref<1x1x128xf32, #tpu.memory_space<vmem>>, vector<1x1x128xf32>
    %107 = vector.shape_cast %106 : vector<1x1x128xf32> to vector<1x128xf32>
    %108 = vector.broadcast %107 : vector<1x128xf32> to vector<8x128xf32>
    %109 = arith.addf %105, %108 : vector<8x128xf32>
    %cst_45 = arith.constant 5.000000e-01 : f32
    %110 = vector.broadcast %cst_45 : f32 to vector<8x128xf32>
    %111 = arith.mulf %110, %109 : vector<8x128xf32>
    %cst_46 = arith.constant 0.707106769 : f32
    %112 = vector.broadcast %cst_46 : f32 to vector<8x128xf32>
    %113 = arith.mulf %109, %112 : vector<8x128xf32>
    %114 = math.erf %113 : vector<8x128xf32>
    %cst_47 = arith.constant 1.000000e+00 : f32
    %115 = vector.broadcast %cst_47 : f32 to vector<8x128xf32>
    %116 = arith.addf %115, %114 : vector<8x128xf32>
    %117 = arith.mulf %111, %116 : vector<8x128xf32>
    %118 = arith.truncf %117 : vector<8x128xf32> to vector<8x128xbf16>
    %c0_48 = arith.constant 0 : index
    %c0_49 = arith.constant 0 : index
    %c0_50 = arith.constant 0 : index
    %119 = vector.load %arg12[%c0_48, %c0_49, %c0_50] : memref<1x128x128xbf16, #tpu.memory_space<vmem>>, vector<1x128x128xbf16>
    %120 = vector.shape_cast %119 : vector<1x128x128xbf16> to vector<128x128xbf16>
    %cst_51 = arith.constant dense<0.000000e+00> : vector<8x128xf32>
    %121 = tpu.matmul %118, %120, %cst_51 {dimension_numbers = #tpu.dot_dimension_numbers<[1], [0], [0], [1], [0, 0, 1, 1], [], []>} : vector<8x128xbf16>, vector<128x128xbf16>, vector<8x128xf32> -> vector<8x128xf32>
    %c0_52 = arith.constant 0 : index
    %c0_53 = arith.constant 0 : index
    %c0_54 = arith.constant 0 : index
    %122 = vector.load %arg13[%c0_52, %c0_53, %c0_54] : memref<1x1x128xf32, #tpu.memory_space<vmem>>, vector<1x1x128xf32>
    %123 = vector.shape_cast %122 : vector<1x1x128xf32> to vector<1x128xf32>
    %124 = vector.broadcast %123 : vector<1x128xf32> to vector<8x128xf32>
    %125 = arith.addf %121, %124 : vector<8x128xf32>
    %126 = arith.addf %125, %75 : vector<8x128xf32>
    %c0_55 = arith.constant 0 : index
    %c0_56 = arith.constant 0 : index
    %127 = vector.load %arg17[%c0_55, %c0_56] : memref<8x128xf32, #tpu.memory_space<vmem>>, vector<8x128xf32>
    tpu.vector_store %arg17[%c0_55, %c0_56], %126 {strides = array<i32>} : memref<8x128xf32, #tpu.memory_space<vmem>>, vector<8x128xf32>,
    %c1_i32 = arith.constant 1 : i32
    %128 = arith.cmpi eq, %arg1, %c1_i32 : i32
    %129 = arith.extui %128 : i1 to i32
    %c0_i32_57 = arith.constant 0 : i32
    %130 = arith.cmpi ne, %129, %c0_i32_57 : i32
    scf.if %130 {
      %c0_58 = arith.constant 0 : index
      %c0_59 = arith.constant 0 : index
      %131 = vector.load %arg14[%c0_58, %c0_59] : memref<1x128xf32, #tpu.memory_space<vmem>>, vector<1x128xf32>
      %c0_60 = arith.constant 0 : index
      %c0_61 = arith.constant 0 : index
      %132 = vector.load %arg15[%c0_60, %c0_61] : memref<1x128xf32, #tpu.memory_space<vmem>>, vector<1x128xf32>
      %cst_62 = arith.constant dense<0.000000e+00> : vector<8xf32>
      %133 = vector.multi_reduction <add>, %126, %cst_62 [1] : vector<8x128xf32> to vector<8xf32>
      %134 = vector.shape_cast %133 : vector<8xf32> to vector<8x1xf32>
      %cst_63 = arith.constant 3.125000e-02 : f32
      %135 = vector.broadcast %cst_63 : f32 to vector<8x1xf32>
      %136 = arith.mulf %134, %135 : vector<8x1xf32>
      %137 = vector.broadcast %136 : vector<8x1xf32> to vector<8x128xf32>
      %138 = arith.subf %126, %137 : vector<8x128xf32>
      %139 = vector.broadcast %4 : vector<1x128xf32> to vector<8x128xf32>
      %140 = arith.mulf %138, %139 : vector<8x128xf32>
      %141 = arith.mulf %140, %140 : vector<8x128xf32>
      %cst_64 = arith.constant dense<0.000000e+00> : vector<8xf32>
      %142 = vector.multi_reduction <add>, %141, %cst_64 [1] : vector<8x128xf32> to vector<8xf32>
      %143 = vector.shape_cast %142 : vector<8xf32> to vector<8x1xf32>
      %cst_65 = arith.constant 3.125000e-02 : f32
      %144 = vector.broadcast %cst_65 : f32 to vector<8x1xf32>
      %145 = arith.mulf %143, %144 : vector<8x1xf32>
      %cst_66 = arith.constant 9.99999974E-6 : f32
      %146 = vector.broadcast %cst_66 : f32 to vector<8x1xf32>
      %147 = arith.addf %145, %146 : vector<8x1xf32>
      %148 = math.rsqrt %147 : vector<8x1xf32>
      %149 = vector.broadcast %148 : vector<8x1xf32> to vector<8x128xf32>
      %150 = arith.mulf %140, %149 : vector<8x128xf32>
      %151 = vector.broadcast %131 : vector<1x128xf32> to vector<8x128xf32>
      %152 = arith.mulf %150, %151 : vector<8x128xf32>
      %153 = vector.broadcast %132 : vector<1x128xf32> to vector<8x128xf32>
      %154 = arith.addf %152, %153 : vector<8x128xf32>
      %155 = vector.shape_cast %154 : vector<8x128xf32> to vector<1x8x128xf32>
      %c0_67 = arith.constant 0 : index
      %c0_68 = arith.constant 0 : index
      %c0_69 = arith.constant 0 : index
      %156 = vector.load %arg16[%c0_67, %c0_68, %c0_69] : memref<1x8x128xf32, #tpu.memory_space<vmem>>, vector<1x8x128xf32>
      tpu.vector_store %arg16[%c0_67, %c0_68, %c0_69], %155 {strides = array<i32>} : memref<1x8x128xf32, #tpu.memory_space<vmem>>, vector<1x8x128xf32>,
    } else {
    }
    return
  }
  func.func @transform_0(%arg0: i32, %arg1: i32) -> (i32, i32, i32) {
    %c0_i32 = arith.constant 0 : i32
    %c0_i32_0 = arith.constant 0 : i32
    %c0_i32_1 = arith.constant 0 : i32
    return %arg0, %c0_i32, %c0_i32_0 : i32, i32, i32
  }
  func.func @transform_1(%arg0: i32, %arg1: i32) -> (i32, i32, i32) {
    %c0_i32 = arith.constant 0 : i32
    %c0_i32_0 = arith.constant 0 : i32
    %c0_i32_1 = arith.constant 0 : i32
    return %arg1, %c0_i32, %c0_i32_0 : i32, i32, i32
  }
  func.func @transform_2(%arg0: i32, %arg1: i32) -> (i32, i32, i32) {
    %c0_i32 = arith.constant 0 : i32
    %c0_i32_0 = arith.constant 0 : i32
    %c0_i32_1 = arith.constant 0 : i32
    return %arg1, %c0_i32, %c0_i32_0 : i32, i32, i32
  }
  func.func @transform_3(%arg0: i32, %arg1: i32) -> (i32, i32, i32) {
    %c0_i32 = arith.constant 0 : i32
    %c0_i32_0 = arith.constant 0 : i32
    %c0_i32_1 = arith.constant 0 : i32
    return %arg1, %c0_i32, %c0_i32_0 : i32, i32, i32
  }
  func.func @transform_4(%arg0: i32, %arg1: i32) -> (i32, i32, i32) {
    %c0_i32 = arith.constant 0 : i32
    %c0_i32_0 = arith.constant 0 : i32
    %c0_i32_1 = arith.constant 0 : i32
    return %arg1, %c0_i32, %c0_i32_0 : i32, i32, i32
  }
  func.func @transform_5(%arg0: i32, %arg1: i32) -> (i32, i32, i32) {
    %c0_i32 = arith.constant 0 : i32
    %c0_i32_0 = arith.constant 0 : i32
    %c0_i32_1 = arith.constant 0 : i32
    return %arg1, %c0_i32, %c0_i32_0 : i32, i32, i32
  }
  func.func @transform_6(%arg0: i32, %arg1: i32) -> (i32, i32, i32) {
    %c0_i32 = arith.constant 0 : i32
    %c0_i32_0 = arith.constant 0 : i32
    %c0_i32_1 = arith.constant 0 : i32
    return %arg1, %c0_i32, %c0_i32_0 : i32, i32, i32
  }
  func.func @transform_7(%arg0: i32, %arg1: i32) -> (i32, i32, i32) {
    %c0_i32 = arith.constant 0 : i32
    %c0_i32_0 = arith.constant 0 : i32
    %c0_i32_1 = arith.constant 0 : i32
    return %arg1, %c0_i32, %c0_i32_0 : i32, i32, i32
  }
  func.func @transform_8(%arg0: i32, %arg1: i32) -> (i32, i32, i32) {
    %c0_i32 = arith.constant 0 : i32
    %c0_i32_0 = arith.constant 0 : i32
    %c0_i32_1 = arith.constant 0 : i32
    return %arg1, %c0_i32, %c0_i32_0 : i32, i32, i32
  }
  func.func @transform_9(%arg0: i32, %arg1: i32) -> (i32, i32, i32) {
    %c0_i32 = arith.constant 0 : i32
    %c0_i32_0 = arith.constant 0 : i32
    %c0_i32_1 = arith.constant 0 : i32
    return %arg1, %c0_i32, %c0_i32_0 : i32, i32, i32
  }
  func.func @transform_10(%arg0: i32, %arg1: i32) -> (i32, i32, i32) {
    %c0_i32 = arith.constant 0 : i32
    %c0_i32_0 = arith.constant 0 : i32
    %c0_i32_1 = arith.constant 0 : i32
    return %arg1, %c0_i32, %c0_i32_0 : i32, i32, i32
  }
  func.func @transform_11(%arg0: i32, %arg1: i32) -> (i32, i32, i32) {
    %c0_i32 = arith.constant 0 : i32
    %c0_i32_0 = arith.constant 0 : i32
    %c0_i32_1 = arith.constant 0 : i32
    return %arg1, %c0_i32, %c0_i32_0 : i32, i32, i32
  }
  func.func @transform_12(%arg0: i32, %arg1: i32) -> (i32, i32) {
    %c0_i32 = arith.constant 0 : i32
    %c0_i32_0 = arith.constant 0 : i32
    %c0_i32_1 = arith.constant 0 : i32
    return %c0_i32, %c0_i32_0 : i32, i32
  }
  func.func @transform_13(%arg0: i32, %arg1: i32) -> (i32, i32) {
    %c0_i32 = arith.constant 0 : i32
    %c0_i32_0 = arith.constant 0 : i32
    %c0_i32_1 = arith.constant 0 : i32
    return %c0_i32, %c0_i32_0 : i32, i32
  }
  func.func @transform_14(%arg0: i32, %arg1: i32) -> (i32, i32, i32) {
    %c0_i32 = arith.constant 0 : i32
    %c0_i32_0 = arith.constant 0 : i32
    %c0_i32_1 = arith.constant 0 : i32
    return %arg0, %c0_i32, %c0_i32_0 : i32, i32, i32
  }
}

</mosaic_0001>

<bundles_post_ra>
// kernel: tpu_custom_call.1
= control target key start
LH: loop header
LB: loop body
LE: loop exit
PB: predicated region body
PF: predicated region fallthrough
CT: control target
= control target key end

     0   :  { %s4242_s0 = inlined_call_operand.hbm [shape: f32[2,8,128], index: 0, kind: input, shape index: {}]   ;;  %s4243_s1 = inlined_call_operand.hbm [shape: f32[2,1,128], index: 1, kind: input, shape index: {}]   ;;  %s4244_s2 = inlined_call_operand.vmem [shape: f32[2,1,128], index: 2, kind: input, shape index: {}]   ;;  %s4245_s3 = inlined_call_operand.hbm [shape: bf16[2,128,384], index: 3, kind: input, shape index: {}]   ;;  %s4246_s4 = inlined_call_operand.hbm [shape: bf16[2,128,128], index: 4, kind: input, shape index: {}]   ;;  %s4247_s5 = inlined_call_operand.vmem [shape: f32[2,1,128], index: 5, kind: input, shape index: {}]   ;;  %s4248_s6 = inlined_call_operand.vmem [shape: f32[2,1,128], index: 6, kind: input, shape index: {}]   ;;  %s4249_s7 = inlined_call_operand.vmem [shape: f32[2,1,128], index: 7, kind: input, shape index: {}]   ;;  %s4250_s8 = inlined_call_operand.hbm [shape: bf16[2,128,128], index: 8, kind: input, shape index: {}]   ;;  %s4251_s9 = inlined_call_operand.vmem [shape: f32[2,1,128], index: 9, kind: input, shape index: {}]   ;;  %s4252_s10 = inlined_call_operand.hbm [shape: bf16[2,128,128], index: 10, kind: input, shape index: {}]   ;;  %s4253_s11 = inlined_call_operand.vmem [shape: f32[2,1,128], index: 11, kind: input, shape index: {}]   ;;  %s4254_s12 = inlined_call_operand.vmem [shape: f32[1,128], index: 12, kind: input, shape index: {}]   ;;  %s4255_s13 = inlined_call_operand.vmem [shape: f32[1,128], index: 13, kind: input, shape index: {}]   ;;  %s4256_s14 = inlined_call_operand.hbm [shape: f32[2,8,128], index: 14, kind: output, shape index: {}]  }
   0x1   :  { %4278 = sst [smem:[#allocation34_spill]] %s4242_s0 }
   0x2   :  { %4279 = sst [smem:[#allocation35_spill]] %s4243_s1 }
   0x3   :  { %4280 = sst [smem:[#allocation36_spill]] %s4244_s2 }
   0x4   :  { %4281 = sst [smem:[#allocation37_spill]] %s4245_s3 }
   0x5   :  { %4282 = sst [smem:[#allocation38_spill]] %s4246_s4 }
   0x6   :  { %4283 = sst [smem:[#allocation39_spill]] %s4247_s5 }
   0x7   :  { %4284 = sst [smem:[#allocation40_spill]] %s4248_s6 }
   0x8   :  { %4285 = sst [smem:[#allocation41_spill]] %s4249_s7 }
   0x9   :  { %4286 = sst [smem:[#allocation42_spill]] %s4250_s8 }
   0xa   :  { %4287 = sst [smem:[#allocation43_spill]] %s4251_s9 }
   0xb   :  { %4288 = sst [smem:[#allocation44_spill]] %s4252_s10 }
   0xc   :  { %4289 = sst [smem:[#allocation45_spill]] %s4253_s11 }
   0xd   :  { %4290 = sst [smem:[#allocation46_spill]] %s4254_s12 }
   0xe   :  { %4291 = sst [smem:[#allocation47_spill]] %s4255_s13 }
   0xf   :  { %4292 = sst [smem:[#allocation48_spill]] %s4256_s14 }
  0x10   :  { %19 = vsyncpa [#allocation4], 0 }
  0x11   :  { %21 = vsyncpa [#allocation4 + $0x1], 0 }
  0x12   :  { %22 = vsyncpa [#allocation7], 0 }
  0x13   :  { %24 = vsyncpa [#allocation7 + $0x1], 0 }
  0x14   :  { %25 = vsyncpa [#allocation10], 0 }
  0x15   :  { %27 = vsyncpa [#allocation10 + $0x1], 0 }
  0x16   :  { %28 = vsyncpa [#allocation13], 0 }
  0x17   :  { %30 = vsyncpa [#allocation13 + $0x1], 0 }
  0x18   :  { %31 = vsyncpa [#allocation5], 0 }
  0x19   :  { %33 = vsyncpa [#allocation5 + $0x1], 0  ;;  %s3568_s29 = smov 0   ;;  %s3570_s30 = smov 0  }
  0x1a   :  { %s3572_s15 = smov 0   ;;  %s3574_s16 = smov 0  }
  0x1b   :  { %s3576_s17 = smov 0   ;;  %s3578_s18 = smov 0  }
  0x1c   :  { %s3580_s19 = smov 0   ;;  %s3582_s20 = smov 0  }
  0x1d   :  { %s3584_s21 = smov 0   ;;  %s3586_s22 = smov 0  }
  0x1e   :  { %s3588_s23 = smov 0  }
  0x1f LB: > { %4293 = sst [smem:[#allocation20_spill]] %s3433_s30  ;;  %s48_s24 = sadd.s32 1, %s3461_s21  ;;  %s3469_s23 = sphi %s3588_s23, %s39_s23   ;;  %s3465_s22 = sphi %s3586_s22, %s4369_s22   ;;  %s3461_s21 = sphi %s3584_s21, %s4365_s21   ;;  %s3457_s20 = sphi %s3582_s20, %s4364_s20   ;;  %s3453_s19 = sphi %s3580_s19, %s4363_s19   ;;  %s3449_s18 = sphi %s3578_s18, %s4362_s18   ;;  %s3445_s17 = sphi %s3576_s17, %s4368_s17   ;;  %s3441_s16 = sphi %s3574_s16, %s4367_s16   ;;  %s3437_s15 = sphi %s3572_s15, %s4360_s15   ;;  %s3433_s30 = sphi %s3570_s30, %s4359_s30   ;;  %s3429_s29 = sphi %s3568_s29, %s4358_s29  }
  0x20   : > { %4294 = sst [smem:[#allocation21_spill]] %s3437_s15  ;;  %p66_p0 = scmp.eq.s32.totalorder %s3469_s23, 0 }
  0x21   : > { %4295 = sst [smem:[#allocation22_spill]] %s3449_s18  ;;  %p3625_p1 = scmp.ge.s32.totalorder %s48_s24, 2 }
  0x22   : > { %4296 = sst [smem:[#allocation23_spill]] %s3453_s19  ;;  %s84_s26 = sadd.s32 1, %s3437_s15 }
  0x23   : > { %4297 = sst [smem:[#allocation24_spill]] %s3457_s20  ;;  %p91_p2 = scmp.ne.s32.totalorder %s3437_s15, %s3433_s30 }
  0x24   : > { %4298 = sst [smem:[#allocation25_spill]] %s3461_s21  ;;  %p97_p3 = scmp.ne.s32.totalorder %s3433_s30, %s3429_s29 }
  0x25   : > { %4299 = sst [smem:[#allocation26_spill]] %s3465_s22  ;;  %s4371_s24 = smov (%p3625_p1, %s48_s24), 0 }
  0x26   : > { %4301 = sst [smem:[#allocation27_spill]] %s4371_s24  ;;  %p93_p4 = por %p91_p2, %p66_p0 }
  0x27   : > { %s81_s27 = ssub.s32 %s3461_s21, %s4371_s24  ;;  %p4262_p5 = scmp.lt.s32.totalorder %s3469_s23, 4 }
  0x28   : > { %p82_p6 = scmp.eq.s32.totalorder %s81_s27, 0  ;;  %s4259_s28 = sand.u32 1, %s3469_s23  }
  0x29   : > { %s3645_s14 = sand.u32 1, %s3437_s15   ;;  %s2693_s13 = sshll.u32 %s3461_s21, 4 }
  0x2a   : > { %s3648_s20 = scalar_select %p82_p6, %s3437_s15, %s84_s26  }
  0x2b   : > { %s4303_s1 = sld [smem:[#allocation35_spill]]  ;;  %s476_s7 = scalar_lea.vmem [#allocation6], %s3645_s14 }
  0x2c   : > { %4302 = sst [smem:[#allocation28_spill]] %s3648_s20  ;;  %s483_s6 = sshll.u32 %s476_s7, 4  ;;  %s484_s6 = int_to_ptr.vmem [resolvable:$true] %s483_s6 }
  0x2d   : > { %p3657_p7 = pnand %p4262_p5, %p93_p4  ;;  %p2704_p8 = scmp.ge.s32.totalorder %s3469_s23, 1 }
  0x2e   : > { %s3665_s5 = scalar_lea.sflag [#allocation7], %s4259_s28  ;;  %s3182_s11 = scalar_lea.vmem %s484_s6, 16 }
  0x2f   : > { %p3669_p9 = pneg %p3657_p7  ;;  %p3183_p10 = scmp.ne.s32.totalorder %s484_s6, %s3182_s11 }
  0x30   : > { %s3471_s7 = smov [#allocation6]  }
  0x31   : > { %s481_s9 = scalar_lea.hbm %s4303_s1, %s2693_s13  ;;  %p3185_p11 = pnand %p3183_p10, %p3669_p9 }
  0x32   : > { %s3187_s12 = sshll.u32 %s3471_s7, 4  ;;  %s3188_s12 = int_to_ptr.vmem [resolvable:$false] %s3187_s12 }
  0x33   : > { %p3186_p12 = pneg %p3185_p11  ;;  %s3189_s13 = scalar_lea.vmem %s3188_s12, 32 }
  0x34   : > { %p3190_p13 = scmp.lt.s32.totalorder %s484_s6, %s3188_s12  ;;  %p3191_p2 = scmp.lt.s32.totalorder %s3189_s13, %s3182_s11 }
  0x36   : > { %p3192_p4 = por %p3191_p2, %p3190_p13 }
  0x38   : > { %p3193_p6 = pnand %p3192_p4, %p3186_p12 }
  0x3a   : > { %3196 = shalt.err (!%p3193_p6)
}
  0x3b   : > { %2973 = dma.hbm_to_vmem [thread:$0]  (!%p3657_p7), %s481_s9, 16, %s484_s6, %s3665_s5  }
  0x3c   : > { %p608_p10 = scmp.lt.s32.totalorder %s3469_s23, 5  ;;  %s3680_s27 = sshll.u32 %s3645_s14, 6 }
  0x3d   : > { %s3683_s7 = sshll.u32 %s3461_s21, 10  ;;  %s4307_s4 = sld [smem:[#allocation38_spill]] }
  0x3e   : > { %p3687_p11 = pnand %p2704_p8, %p608_p10  ;;  %s521_s1 = scalar_lea.vmem [#allocation9], %s3680_s27 }
  0x3f   : > { %s528_s20 = sshll.u32 %s521_s1, 4  ;;  %s4308_s6 = sand.u32 1, %s3469_s23   ;;  %s529_s20 = int_to_ptr.vmem [resolvable:$true] %s528_s20 }
  0x40   : > { %s4306_s11 = scalar_select %p3687_p11, 1, 0 }
  0x41   : > { %s3698_s9 = scalar_lea.sflag [#allocation10], %s4308_s6  ;;  %s3210_s15 = scalar_lea.vmem %s529_s20, 1024 }
  0x42   : > { %p3211_p12 = scmp.ne.s32.totalorder %s529_s20, %s3210_s15  ;;  %s3472_s2 = smov [#allocation9]  }
  0x43   : > { %s527_s28 = scalar_lea.hbm %s4307_s4, %s3683_s7  ;;  %s3215_s19 = sshll.u32 %s3472_s2, 4  ;;  %s3216_s19 = int_to_ptr.vmem [resolvable:$false] %s3215_s19 }
  0x44   : > { %p3213_p13 = pnand %p3211_p12, %p3669_p9  ;;  %s3217_s10 = scalar_lea.vmem %s3216_s19, 2048 }
  0x45   : > { %p3218_p8 = scmp.lt.s32.totalorder %s529_s20, %s3216_s19  ;;  %p3219_p4 = scmp.lt.s32.totalorder %s3217_s10, %s3210_s15 }
  0x46   : > { %p3214_p2 = pneg %p3213_p13 }
  0x47   : > { %p3220_p6 = por %p3219_p4, %p3218_p8 }
  0x49   : > { %p3221_p10 = pnand %p3220_p6, %p3214_p2 }
  0x4b   : > { %3224 = shalt.err (!%p3221_p10)
}
  0x4c   : > { %s4263_s12 = smov 64   ;;  %s4265_s1 = smov 4  }
  0x4d   : > { %2979 = dma.hbm_to_vmem [thread:$0]  (!%p3657_p7), %s527_s28, 1024, %s529_s20, %s3698_s9, %s4263_s12, %s4263_s12, %s4265_s1  }
  0x4e   : > { %s3709_s2 = sadd.s32 4294967295, %s3469_s23   ;;  %s2688_s10 = sadd.s32 4294967294, %s3469_s23  }
  0x4f   : > { %4309 = sst [smem:[#allocation29_spill]] %s3709_s2  ;;  %s51_s15 = sadd.s32 1, %s3465_s22 }
  0x50   : > { %s58_s19 = sadd.s32 1, %s3449_s18  ;;  %s4373_s15 = smov (!%p3625_p1, %s51_s15), %s3465_s22 }
  0x51   : > { %p65_p12 = scmp.ne.s32.totalorder %s3449_s18, %s3445_s17  ;;  %p71_p13 = scmp.ne.s32.totalorder %s3445_s17, %s3441_s16 }
  0x52   : > { %p53_p2 = scmp.ge.s32.totalorder %s4373_s15, 2  ;;  %p72_p8 = scmp.eq.s32.totalorder %s3709_s2, 0 }
  0x53   : > { %p3724_p4 = por %p66_p0, %p65_p12  ;;  %p423_p6 = scmp.eq.s32.totalorder %s3709_s2, 3 }
  0x54   : > { %s4375_s15 = smov (%p53_p2, %s4373_s15), 0  ;;  %p3734_p1 = por %p72_p8, %p71_p13 }
  0x55   : > { %4311 = sst [smem:[#allocation30_spill]] %s4375_s15  ;;  %p3741_p10 = por %p97_p3, %p72_p8 }
  0x56   : > { %s4312_s25 = scalar_select %p3734_p1, 1, 0 }
  0x57   : > { %s55_s13 = ssub.s32 %s3465_s22, %s4375_s15  ;;  %p3747_p0 = por %p423_p6, %p65_p12 }
  0x58   : > { %4313 = sst [smem:[#allocation31_spill]] %s4312_s25  ;;  %p56_p5 = scmp.eq.s32.totalorder %s55_s13, 0 }
  0x59   : > { %s4315_s6 = scalar_select %p3747_p0, 1, 0 }
  0x5a   : > { %p429_p11 = scmp.eq.s32.totalorder %s2688_s10, 3  ;;  %s455_s12 = sand.u32 1, %s3449_s18  }
  0x5b   : > { %4316 = sst [smem:[#allocation32_spill]] %s4315_s6  ;;  %s2692_s1 = sshll.u32 %s3465_s22, 7 }
  0x5c   : > { %s3754_s4 = scalar_select %p56_p5, %s3449_s18, %s58_s19  }
  0x5d   : > { %p3759_p2 = por %p429_p11, %p71_p13  ;;  %s2691_s29 = sshll.u32 %s455_s12, 3 }
  0x5e   : > { %4317 = sst [smem:[#allocation33_spill]] %s3754_s4  ;;  %p4320_p3 = scmp.lt.s32.totalorder %s3469_s23, 4 }
  0x5f   : > { %s4318_s2 = scalar_select %p3759_p2, 1, 0 }
  0x60   : > { %s4319_s0 = sld [smem:[#allocation34_spill]]  ;;  %p3770_p12 = pnand %p4320_p3, %p3724_p4 }
  0x61   : > { %s459_s10 = scalar_lea.vmem [#allocation3], %s2691_s29  ;;  %s456_s13 = scalar_lea.sflag [#allocation4], %s455_s12 }
  0x62   : > { %s466_s19 = sshll.u32 %s459_s10, 4  ;;  %p3227_p5 = pneg %p3770_p12  ;;  %s467_s19 = int_to_ptr.vmem [resolvable:$true] %s466_s19 }
  0x63   : > { %s3238_s22 = scalar_lea.vmem %s467_s19, 128  ;;  %s3475_s4 = smov [#allocation3]  }
  0x64   : > { %p3239_p11 = scmp.ne.s32.totalorder %s467_s19, %s3238_s22  ;;  %s3243_s30 = sshll.u32 %s3475_s4, 4  ;;  %s3244_s30 = int_to_ptr.vmem [resolvable:$false] %s3243_s30 }
  0x65   : > { %p3246_p6 = scmp.lt.s32.totalorder %s467_s19, %s3244_s30 }
  0x66   : > { %s464_s15 = scalar_lea.hbm %s4319_s0, %s2692_s1  ;;  %p3241_p13 = pnand %p3239_p11, %p3227_p5 }
  0x67   : > { %s3245_s1 = scalar_lea.vmem %s3244_s30, 256 }
  0x68   : > { %p3242_p8 = pneg %p3241_p13  ;;  %p3247_p4 = scmp.lt.s32.totalorder %s3245_s1, %s3238_s22 }
  0x6a   : > { %p3248_p3 = por %p3247_p4, %p3246_p6 }
  0x6c   : > { %p3249_p2 = pnand %p3248_p3, %p3242_p8 }
  0x6e   : > { %3252 = shalt.err (!%p3249_p2)
}
  0x6f   : > { %2970 = dma.hbm_to_vmem [thread:$0]  (!%p3770_p12), %s464_s15, 128, %s467_s19, %s456_s13  }
  0x70   : > { %s2951_s12 = smul.u32 3072, %s3461_s21  ;;  %s4323_s3 = sld [smem:[#allocation37_spill]] }
  0x71   : > { %s4322_s20 = smul.u32 192, %s3645_s14  ;;  %s3476_s22 = smov [#allocation8]  }
  0x72   : > { %s3271_s6 = sshll.u32 %s3476_s22, 4  ;;  %s3272_s6 = int_to_ptr.vmem [resolvable:$false] %s3271_s6 }
  0x73   : > { %s500_s25 = scalar_lea.vmem [#allocation8], %s4322_s20  ;;  %s3273_s1 = scalar_lea.vmem %s3272_s6, 6144 }
  0x74   : > { %s507_s29 = sshll.u32 %s500_s25, 4  ;;  %s508_s29 = int_to_ptr.vmem [resolvable:$true] %s507_s29 }
  0x75   : > { %s3266_s30 = scalar_lea.vmem %s508_s29, 3072  ;;  %p3274_p13 = scmp.lt.s32.totalorder %s508_s29, %s3272_s6 }
  0x76   : > { %s506_s0 = scalar_lea.hbm %s4323_s3, %s2951_s12  ;;  %p3267_p5 = scmp.ne.s32.totalorder %s508_s29, %s3266_s30 }
  0x77   : > { %p3275_p12 = scmp.lt.s32.totalorder %s3273_s1, %s3266_s30 }
  0x78   : > { %p3269_p11 = pnand %p3267_p5, %p3669_p9 }
  0x79   : > { %p3276_p8 = por %p3275_p12, %p3274_p13 }
  0x7a   : > { %p3270_p2 = pneg %p3269_p11 }
  0x7c   : > { %p3277_p6 = pnand %p3276_p8, %p3270_p2 }
  0x7e   : > { %3280 = shalt.err (!%p3277_p6)
}
  0x7f   : > { %s3477_s15 = smov 192   ;;  %s3478_s19 = smov 12  }
  0x80   : > { %2976 = dma.hbm_to_vmem [thread:$0]  (!%p3657_p7), %s506_s0, 3072, %s508_s29, %s3665_s5, %s3477_s15, %s3477_s15, %s3478_s19  }
  0x81   : > { %s4324_s8 = sld [smem:[#allocation42_spill]]  ;;  %s560_s25 = scalar_lea.vmem [#allocation11], %s3680_s27 }
  0x82   : > { %s567_s10 = sshll.u32 %s560_s25, 4  ;;  %s3479_s30 = smov [#allocation11]   ;;  %s568_s10 = int_to_ptr.vmem [resolvable:$true] %s567_s10 }
  0x83   : > { %s3294_s4 = scalar_lea.vmem %s568_s10, 1024  ;;  %s3299_s22 = sshll.u32 %s3479_s30, 4  ;;  %s3300_s22 = int_to_ptr.vmem [resolvable:$false] %s3299_s22 }
  0x84   : > { %p3295_p4 = scmp.ne.s32.totalorder %s568_s10, %s3294_s4  ;;  %s3301_s6 = scalar_lea.vmem %s3300_s22, 2048 }
  0x85   : > { %p3302_p11 = scmp.lt.s32.totalorder %s568_s10, %s3300_s22  ;;  %p3303_p2 = scmp.lt.s32.totalorder %s3301_s6, %s3294_s4 }
  0x86   : > { %p3297_p3 = pnand %p3295_p4, %p3669_p9 }
  0x87   : > { %s566_s20 = scalar_lea.hbm %s4324_s8, %s3683_s7  ;;  %p3304_p13 = por %p3303_p2, %p3302_p11 }
  0x88   : > { %p3298_p5 = pneg %p3297_p3 }
  0x8a   : > { %p3305_p12 = pnand %p3304_p13, %p3298_p5 }
  0x8c   : > { %3308 = shalt.err (!%p3305_p12)
}
  0x8d   : > { %s4325_s0 = smov 4   ;;  %s4326_s5 = smov 64  }
  0x8e   : > { %2982 = dma.hbm_to_vmem [thread:$0]  (!%p3657_p7), %s566_s20, 1024, %s568_s10, %s3698_s9, %s4326_s5, %s4326_s5, %s4325_s0  }
  0x8f   : > { %s4327_s15 = sld [smem:[#allocation44_spill]]  ;;  %s587_s13 = scalar_lea.vmem [#allocation12], %s3680_s27 }
  0x90   : > { %s594_s12 = sshll.u32 %s587_s13, 4  ;;  %s584_s25 = scalar_lea.sflag [#allocation13], %s3645_s14  ;;  %s595_s12 = int_to_ptr.vmem [resolvable:$true] %s594_s12 }
  0x91   : > { %s3322_s4 = scalar_lea.vmem %s595_s12, 1024  ;;  %s3480_s30 = smov [#allocation12]  }
  0x92   : > { %p3323_p8 = scmp.ne.s32.totalorder %s595_s12, %s3322_s4  ;;  %s3327_s22 = sshll.u32 %s3480_s30, 4  ;;  %s3328_s22 = int_to_ptr.vmem [resolvable:$false] %s3327_s22 }
  0x93   : > { %s3329_s6 = scalar_lea.vmem %s3328_s22, 2048  ;;  %p3330_p3 = scmp.lt.s32.totalorder %s595_s12, %s3328_s22 }
  0x94   : > { %p3325_p6 = pnand %p3323_p8, %p3669_p9  ;;  %p3331_p5 = scmp.lt.s32.totalorder %s3329_s6, %s3322_s4 }
  0x95   : > { %s593_s19 = scalar_lea.hbm %s4327_s15, %s3683_s7 }
  0x96   : > { %p3326_p4 = pneg %p3325_p6  ;;  %p3332_p11 = por %p3331_p5, %p3330_p3 }
  0x98   : > { %p3333_p2 = pnand %p3332_p11, %p3326_p4 }
  0x9a   : > { %3336 = shalt.err (!%p3333_p2)
}
  0x9b   : > { %2985 = dma.hbm_to_vmem [thread:$0]  (!%p3657_p7), %s593_s19, 1024, %s595_s12, %s584_s25, %s4326_s5, %s4326_s5, %s4325_s0  }
  0x9c   : > { %p4328_p13 = scmp.ne.s32.totalorder %s4306_s11, 0 }
  0x9d   : > { %s3818_s27 = sand.u32 (!%p4328_p13), 1, %s3445_s17  }
  0x9e   : > { %612 = sbr.rel (%p4328_p13) target bundleno = 3009 (0xbc1), region = 76  ;;  %s4275_s26 = sshll.u32 (!%p4328_p13), %s3818_s27, 3 }
  0x9f   : > { %s615_s7 = scalar_lea.sflag (!%p4328_p13), [#allocation4], %s3818_s27  ;;  %s3824_s9 = scalar_lea.vmem (!%p4328_p13), [#allocation3], %s4275_s26 }
  0xa3   : > { %3408 = dma.done.wait (%p3734_p1), %s615_s7, 128  }
  0xa4   : > { %3410 = vsyncadd (%p3734_p1), %s615_s7, 4294967168  ;;  %s4330_s24 = sld [smem:[#allocation29_spill]] }
  0xa5   : > { %s4331_s11 = sld [smem:[#allocation20_spill]] }
  0xaa   : > { %s623_s20 = sand.u32 1, %s4330_s24  }
  0xab   : > { %s3832_s10 = sand.u32 1, %s4331_s11   ;;  %s624_s0 = scalar_lea.sflag [#allocation7], %s623_s20 }
  0xac   : > { %3412 = dma.done.wait (%p3741_p10), %s624_s0, 3088  }
  0xad   : > { %3414 = vsyncadd (%p3741_p10), %s624_s0, 4294964208  ;;  %s2952_s29 = smul.u32 192, %s3832_s10  ;;  %s3841_s1 = sshll.u32 %s3832_s10, 6 }
  0xae   : > { %s641_s19 = scalar_lea.sflag [#allocation10], %s623_s20 }
  0xaf   : > { %s3843_s15 = scalar_lea.vmem [#allocation8], %s2952_s29 }
  0xb0   : > { %3416 = dma.done.wait (%p3741_p10), %s641_s19, 2048  }
  0xb1   : > { %3418 = vsyncadd (%p3741_p10), %s641_s19, 4294965248  ;;  %s3851_s12 = scalar_lea.vmem [#allocation11], %s3841_s1  ;;  %s659_s25 = scalar_lea.sflag [#allocation13], %s3832_s10 }
  0xb2   : > { %s3855_s4 = scalar_lea.vmem [#allocation12], %s3841_s1 }
  0xb3   : > { %3420 = dma.done.wait (%p3741_p10), %s659_s25, 1024  }
  0xb4   : > { %3422 = vsyncadd (%p3741_p10), %s659_s25, 4294966272  ;;  %s4332_s30 = sld [smem:[#allocation23_spill]]  ;;  %v768_v0 = vlaneseq  ;;  %v3481_v2 = vmov 0.0   ;;  %s4339_s0 = sshll.u32 %s3818_s27, 3 }
  0xb5   : > { %s4335_s25 = sld [smem:[#allocation40_spill]]  ;;  %s3895_s18 = scalar_lea.vmem [#allocation14], %s4339_s0 }
  0xb6   : > { %v769_v1 = vand.u32 127, %v768_v0  ;;  %s4336_s3 = sld [smem:[#allocation41_spill]] }
  0xb7   : > { %s4337_s14 = sld [smem:[#allocation43_spill]] }
  0xb8   : > { %vm770_vm0 = vcmp.lt.s32.totalorder %v769_v1, 32  ;;  %s4338_s11 = sld [smem:[#allocation45_spill]] }
  0xb9   : > { %v3883_v3 = vsel %vm770_vm0, 1.0, %v3481_v2 }
  0xba   : > { %p749_p7 = scmp.lt.s32.totalorder %s4332_s30, 1  ;;  %p2711_p9 = scmp.ne.s32.totalorder %s4332_s30, 0 }
  0xbc   : > { %s3863_s22 = scalar_select %p749_p7, %s4332_s30, 1 }
  0xbd   : > { %776 = sbr.rel (%p2711_p9) target bundleno = 196 (0xc4), region = 104 }
  0xbe   : > { %s757_s13 = scalar_lea.vmem %s4335_s25, %s3863_s22  ;;  %s760_s8 = scalar_lea.vmem %s4336_s3, %s3863_s22 }
  0xbf   : > { %s763_s7 = scalar_lea.vmem %s4337_s14, %s3863_s22  ;;  %s766_s20 = scalar_lea.vmem %s4338_s11, %s3863_s22 }
  0xc2   : > { %v777_v4 = vld [vmem:[%s3824_s9] sm:$0xff] }
  0xc3   : > { %778 = vst [vmem:[#allocation2] sm:$0xff] %v777_v4 }
  0xc4 PF: > { %2834 = vmatprep.subr.bf16.mxu1 %v3481_v2  ;;  %v3095_v6 = vld [vmem:[%s3843_s15 + $0xac] ss:$12 sps:$4 sm:$0xff]   ;;  %v3097_v7 = vld [vmem:[%s3843_s15 + $0xa8] ss:$12 sps:$4 sm:$0xff]   ;;  %v3098_v8 = vld [vmem:[%s3843_s15 + $0xb0] ss:$12 sps:$4 sm:$0xff]  }
  0xc5   : > { %v3099_v9 = vld [vmem:[%s3843_s15 + $0x94] ss:$12 sps:$4 sm:$0xff]   ;;  %v3101_v10 = vld [vmem:[%s3843_s15 + $0x90] ss:$12 sps:$4 sm:$0xff]   ;;  %v3102_v11 = vld [vmem:[%s3843_s15 + $0x98] ss:$12 sps:$4 sm:$0xff]   ;;  %969 = vmatprep.subr.bf16.mxu0 %v3095_v6  ;;  %2835 = vmatpush3.bf16.msra.mxu1 %v3098_v8 }
  0xc6   : > { %970 = vmatpush1.bf16.msra.mxu0 %v3097_v7  ;;  %2836 = vmatprep.subr.bf16.mxu1 %v3481_v2  ;;  %v3103_v17 = vld [vmem:[%s3843_s15 + $0x7c] ss:$12 sps:$4 sm:$0xff]   ;;  %v3105_v18 = vld [vmem:[%s3843_s15 + $0x78] ss:$12 sps:$4 sm:$0xff]   ;;  %v3106_v19 = vld [vmem:[%s3843_s15 + $0x80] ss:$12 sps:$4 sm:$0xff]  }
  0xc7   : > { %971 = vmatprep.subr.bf16.mxu0 %v3099_v9  ;;  %v3107_v20 = vld [vmem:[%s3843_s15 + $0x64] ss:$12 sps:$4 sm:$0xff]   ;;  %v3109_v21 = vld [vmem:[%s3843_s15 + $0x60] ss:$12 sps:$4 sm:$0xff]   ;;  %v3110_v22 = vld [vmem:[%s3843_s15 + $0x68] ss:$12 sps:$4 sm:$0xff]  }
  0xc8   : > { %v3111_v23 = vld [vmem:[%s3843_s15 + $0x4c] ss:$12 sps:$4 sm:$0xff]   ;;  %v3113_v24 = vld [vmem:[%s3843_s15 + $0x48] ss:$12 sps:$4 sm:$0xff]   ;;  %v3114_v25 = vld [vmem:[%s3843_s15 + $0x50] ss:$12 sps:$4 sm:$0xff]  }
  0xc9   : > { %2837 = vmatpush3.bf16.msra.mxu1 %v3102_v11  ;;  %v3115_v26 = vld [vmem:[%s3843_s15 + $0x34] ss:$12 sps:$4 sm:$0xff]   ;;  %v3482_v27 = vmov 0   ;;  %vm3483_vm1 = vmmov 0   ;;  %v3117_v28 = vld [vmem:[%s3843_s15 + $0x30] ss:$12 sps:$4 sm:$0xff]  }
  0xca   : > { %v3899_v5 = vld [vmem:[#allocation2] sm:$0xff]  ;;  %972 = vmatpush1.bf16.msra.mxu0 %v3101_v10  ;;  %2838 = vmatprep.subr.bf16.mxu1 %v3481_v2  ;;  %s4340_s3 = scalar_lea.vmem [#allocation6], %s3832_s10  ;;  %s4341_s9 = sld [smem:[#allocation36_spill]]  ;;  %v3487_v54 = vmov 1983009808   ;;  %v1066_v59 = vshrl.u32 %v768_v0, 7 }
  0xcb   : > { %782 = vadd.xlane.f32.xlu0 %v3899_v5  ;;  %973 = vmatprep.subr.bf16.mxu0 %v3103_v17  ;;  %v3118_v29 = vld [vmem:[%s3843_s15 + $0x38] ss:$12 sps:$4 sm:$0xff]   ;;  %v3119_v30 = vld [vmem:[%s3843_s15 + $0x1c] ss:$12 sps:$4 sm:$0xff]   ;;  %v3122_v32 = vld [vmem:[%s3843_s15 + $0x20] ss:$12 sps:$4 sm:$0xff]   ;;  %v1063_v55 = vunpack.c.l.s4 %v3487_v54 }
  0xcc   : > { %1001 = vmatprep.mubr.bf16.mxu0 %v3482_v27  ;;  %2850 = vmatprep.mubr.msk.bf16.mxu1 %vm3483_vm1, %v3481_v2  ;;  %v3121_v31 = vld [vmem:[%s3843_s15 + $0x18] ss:$12 sps:$4 sm:$0xff]   ;;  %v3125_v34 = vld [vmem:[%s3843_s15] ss:$12 sps:$4 sm:$0xff]   ;;  %v3126_v35 = vld [vmem:[%s3843_s15 + $0x8] ss:$12 sps:$4 sm:$0xff]  }
  0xcd   : > { %2839 = vmatpush3.bf16.msra.mxu1 %v3106_v19  ;;  %v3123_v33 = vld [vmem:[%s3843_s15 + $0x4] ss:$12 sps:$4 sm:$0xff]   ;;  %s3484_s10 = smov 104   ;;  %s3485_s15 = smov 120   ;;  %v3488_v56 = vmov 1934713408   ;;  %v1064_v58 = vunpack.c.0.s8 %v1063_v55 }
  0xce   : > { %974 = vmatpush1.bf16.msra.mxu0 %v3105_v18  ;;  %2840 = vmatprep.subr.bf16.mxu1 %v3481_v2  ;;  %v2712_v40 = vld [vmem:[%s4340_s3] ss:$0 sm:$0xff]  ;;  %s3486_s30 = smov 112   ;;  %v1095_v57 = vunpack.c.l.s4 %v3488_v56  ;;  %vm1500_vm2 = vcmask 64512   ;;  %vm1736_vm3 = vcmask 1043456   ;;  %s4343_s28 = scalar_lea.vmem [#allocation9], %s3841_s1 }
  0xcf   : > { %975 = vmatprep.subr.bf16.mxu0 %v3107_v20  ;;  %v3965_v63 = vsub.s32 %v1064_v58, %v1066_v59  ;;  %s4344_s0 = smov %s4343_s28  ;;  %s3489_s1 = smov 16   ;;  %vm2067_vm4 = vcmask 130048   ;;  %vm2069_vm5 = vcmask 195584   ;;  %vm2095_vm6 = vcmask 261120  }
  0xd0   : > { %s4342_s5 = scalar_lea.vmem %s4341_s9, %s3863_s22  ;;  %v1096_v62 = vunpack.c.0.s8 %v1095_v57  ;;  %s3490_s29 = smov 8  }
  0xd1   : > { %2841 = vmatpush3.bf16.msra.mxu1 %v3110_v22  ;;  %v2713_v42 = vld [vmem:[%s4342_s5] ss:$0 sm:$0xff]  ;;  %s3491_s19 = smov 24   ;;  %s4345_s14 = sld [smem:[#allocation39_spill]] }
  0xd2   : > { %976 = vmatpush1.bf16.msra.mxu0 %v3109_v21  ;;  %2842 = vmatprep.subr.bf16.mxu1 %v3481_v2  ;;  %v3967_v9 = vsub.s32 %v1096_v62, %v1066_v59 }
  0xd3   : > { %977 = vmatprep.subr.bf16.mxu0 %v3111_v23 }
  0xd5   : > { %2843 = vmatpush3.bf16.msra.mxu1 %v3114_v25 }
  0xd6   : > { %978 = vmatpush1.bf16.msra.mxu0 %v3113_v24  ;;  %2844 = vmatprep.subr.bf16.mxu1 %v3481_v2 }
  0xd7   : > { %979 = vmatprep.subr.bf16.mxu0 %v3115_v26  ;;  %s4346_s24 = scalar_lea.vmem %s4345_s14, %s3863_s22 }
  0xd9   : > { %2845 = vmatpush3.bf16.msra.mxu1 %v3118_v29 }
  0xda   : > { %980 = vmatpush1.bf16.msra.mxu0 %v3117_v28  ;;  %2846 = vmatprep.subr.bf16.mxu1 %v3481_v2 }
  0xdb   : > { %981 = vmatprep.subr.bf16.mxu0 %v3119_v30 }
  0xdd   : > { %2847 = vmatpush3.bf16.msra.mxu1 %v3122_v32 }
  0xde   : > { %982 = vmatpush1.bf16.msra.mxu0 %v3121_v31  ;;  %2848 = vmatprep.subr.bf16.mxu1 %v3481_v2 }
  0xdf   : > { %983 = vmatprep.subr.bf16.mxu0 %v3123_v33 }
  0xe1   : > { %2849 = vmatpush3.bf16.msra.mxu1 %v3126_v35 }
  0xe2   : > { %984 = vmatpush1.bf16.msra.mxu0 %v3125_v34  ;;  %2860 = vmatprep.subr.bf16.mxu1 %v3481_v2 }
  0xe3   : > { %2854 = vmatprep.subr.bf16.mxu0 %v3481_v2 }
 0x154   : > { %v783_v12 = vpop.xlane.xlu0 %782 }
 0x155   : > { %v784_v13 = vmul.f32 0.03125, %v783_v12 }
 0x157   : > { %v785_v14 = vsub.f32 %v3899_v5, %v784_v13 }
 0x159   : > { %v786_v15 = vmul.f32 %v3883_v3, %v785_v14 }
 0x15b   : > { %v787_v16 = vmul.f32 %v786_v15, %v786_v15 }
 0x15d   : > { %788 = vadd.xlane.f32.xlu0 %v787_v16 }
 0x1e6   : > { %v789_v36 = vpop.xlane.xlu0 %788 }
 0x1e7   : > { %v790_v37 = vmul.f32 0.03125, %v789_v36 }
 0x1e9   : > { %v791_v38 = vadd.f32 1e-05, %v790_v37 }
 0x1eb   : > { %3145 = vrsqrt.f32 %v791_v38 }
 0x1f8   : > { %v3146_v39 = vpop.eup %3145 }
 0x1f9   : > { %v793_v41 = vmul.f32 %v3146_v39, %v786_v15 }
 0x1fb   : > { %v800_v43 = vmul.f32 %v2712_v40, %v793_v41 }
 0x1fd   : > { %v807_v44 = vadd.f32 %v2713_v42, %v800_v43 }
 0x1ff   : > { %v808_v45 = vpack.c.bf16 %v807_v44, %v807_v44 }
 0x201   : > { %1002 = vmatmul.mubr.bf16.vlgmr.msra.gmra.mxu0 %v808_v45  ;;  %2851 = vmatmul.mubr.bf16.vlgmr.msra.gmra.mxu1 %v808_v45 }
 0x202   : > { %2856 = vmatprep.mubr.msk.bf16.mxu0 %vm3483_vm1, %v3481_v2  ;;  %2862 = vmatprep.mubr.msk.bf16.mxu1 %vm3483_vm1, %v3481_v2 }
 0x2c1   : > { %v3951_v46 = vpop.f32.mrf.mxu0  ;;  %v3953_v47 = vpop.f32.mrf.mxu1 }
 0x2c3   : > { %v1005_v48 = vpop.f32.mrf.mxu0  ;;  %v2852_v49 = vpop.f32.mrf.mxu1 }
 0x2c4   : > { %1207 = vrot.lane.b32.xlu0 %v1005_v48, %s3484_s10  ;;  %1201 = vrot.lane.b32.xlu1 %v1005_v48, %s3485_s15 }
 0x2c5   : > { %v1007_v50 = vpop.f32.mrf.mxu0  ;;  %v1047_v51 = vpop.f32.mrf.mxu1 }
 0x2c7   : > { %v1008_v52 = vpop.f32.mrf.mxu0  ;;  %v2853_v53 = vpop.f32.mrf.mxu1 }
 0x2c8   : > { %1204 = vrot.lane.b32.xlu1 %v1005_v48, %s3486_s30 }
 0x2cc   : > { %1051 = vrot.lane.b32.xlu1 %v3951_v46, %s3485_s15 }
 0x2d0   : > { %1054 = vrot.lane.b32.xlu1 %v3951_v46, %s3486_s30 }
 0x2d4   : > { %1057 = vrot.lane.b32.xlu1 %v3951_v46, %s3484_s10 }
 0x336   : > { %v1208_v60 = vpop.permute.xlu0 %1207  ;;  %v1202_v61 = vpop.permute.xlu1 %1201 }
 0x337   : > { %v1226_v1 = vcombine.low %v1202_v61, %v1208_v60  ;;  %v1227_v4 = vcombine.high %v1202_v61, %v1208_v60 }
 0x339   : > { %v1234_v10 = vrot.slane %v1226_v1, %v3965_v63  ;;  %v1241_v11 = vrot.slane %v1227_v4, %v3965_v63 }
 0x33a   : > { %v1205_v6 = vpop.permute.xlu1 %1204 }
 0x33b   : > { %v1210_v7 = vcombine.low %v1005_v48, %v1205_v6  ;;  %v1211_v8 = vcombine.high %v1005_v48, %v1205_v6 }
 0x33d   : > { %v1218_v12 = vrot.slane %v1210_v7, %v3965_v63  ;;  %v1225_v0 = vrot.slane %v1211_v8, %v3965_v63 }
 0x33e   : > { %v1052_v13 = vpop.permute.xlu1 %1051 }
 0x33f   : > { %v1242_v14 = vcombine.low %v1218_v12, %v1234_v10  ;;  %v1243_v15 = vcombine.high %v1218_v12, %v1234_v10  ;;  %v1258_v16 = vcombine.low %v1225_v0, %v1241_v11  ;;  %v1259_v17 = vcombine.high %v1225_v0, %v1241_v11 }
 0x341   : > { %v1250_v18 = vrot.slane %v1242_v14, %v3967_v9  ;;  %v1257_v19 = vrot.slane %v1243_v15, %v3967_v9  ;;  %v1266_v20 = vrot.slane %v1258_v16, %v3967_v9  ;;  %v1273_v21 = vrot.slane %v1259_v17, %v3967_v9 }
 0x342   : > { %v1055_v22 = vpop.permute.xlu1 %1054 }
 0x343   : > { %v1278_v23 = vcombine.low %v1250_v18, %v1257_v19  ;;  %v2740_v24 = vcombine.high %v1250_v18, %v1257_v19  ;;  %v1294_v25 = vcombine.low %v1266_v20, %v1273_v21  ;;  %v2741_v26 = vcombine.high %v1266_v20, %v1273_v21 }
 0x344   : > { %v1060_v27 = vcombine.low %v3951_v46, %v1055_v22  ;;  %v1061_v28 = vcombine.high %v3951_v46, %v1055_v22 }
 0x345   : > { %v1285_v29 = vrot.slane %v1278_v23, %v3965_v63  ;;  %v1293_v30 = vrot.slane %v2740_v24, %v3965_v63  ;;  %v1301_v31 = vrot.slane %v1294_v25, %v3965_v63  ;;  %v1309_v32 = vrot.slane %v2741_v26, %v3965_v63 }
 0x346   : > { %v1058_v33 = vpop.permute.xlu1 %1057  ;;  %v1068_v38 = vrot.slane %v1060_v27, %v3965_v63  ;;  %v1075_v39 = vrot.slane %v1061_v28, %v3965_v63 }
 0x347   : > { %v1076_v34 = vcombine.low %v1052_v13, %v1058_v33  ;;  %v1077_v35 = vcombine.high %v1052_v13, %v1058_v33  ;;  %v1310_v36 = vcombine.low %v1285_v29, %v1293_v30  ;;  %v1326_v37 = vcombine.low %v1301_v31, %v1309_v32 }
 0x348   : > { %v1311_v44 = vcombine.high %v1285_v29, %v1293_v30  ;;  %v1327_v45 = vcombine.high %v1301_v31, %v1309_v32 }
 0x349   : > { %v1084_v40 = vrot.slane %v1076_v34, %v3965_v63  ;;  %v1091_v41 = vrot.slane %v1077_v35, %v3965_v63  ;;  %v1318_v42 = vrot.slane %v1310_v36, %v3967_v9  ;;  %v1334_v43 = vrot.slane %v1326_v37, %v3967_v9 }
 0x34a   : > { %v1325_v59 = vrot.slane %v1311_v44, %v3967_v9  ;;  %v1341_v60 = vrot.slane %v1327_v45, %v3967_v9 }
 0x34b   : > { %v1092_v46 = vcombine.low %v1068_v38, %v1084_v40  ;;  %v1093_v48 = vcombine.high %v1068_v38, %v1084_v40  ;;  %v1108_v49 = vcombine.low %v1075_v39, %v1091_v41  ;;  %v1109_v50 = vcombine.high %v1075_v39, %v1091_v41 }
 0x34c   : > { %v1342_v51 = vcombine.low %v1318_v42, %v1334_v43  ;;  %v1343_v52 = vcombine.high %v1318_v42, %v1334_v43  ;;  %v1344_v14 = vcombine.low %v1325_v59, %v1341_v60  ;;  %v1345_v15 = vcombine.high %v1325_v59, %v1341_v60 }
 0x34d   : > { %v1100_v53 = vrot.slane %v1092_v46, %v3967_v9  ;;  %v1107_v54 = vrot.slane %v1093_v48, %v3967_v9  ;;  %v1116_v55 = vrot.slane %v1108_v49, %v3967_v9  ;;  %v1123_v56 = vrot.slane %v1109_v50, %v3967_v9 }
 0x34e   : > { %v1346_v57 = vpack.c.bf16 %v1342_v51, %v1342_v51  ;;  %v1347_v58 = vpack.c.bf16 %v1343_v52, %v1343_v52  ;;  %v1348_v22 = vpack.c.bf16 %v1344_v14, %v1344_v14  ;;  %v1349_v23 = vpack.c.bf16 %v1345_v15, %v1345_v15 }
 0x34f   : > { %v1128_v61 = vcombine.low %v1100_v53, %v1107_v54  ;;  %v2738_v62 = vcombine.high %v1100_v53, %v1107_v54  ;;  %v1144_v1 = vcombine.low %v1116_v55, %v1123_v56  ;;  %v2739_v4 = vcombine.high %v1116_v55, %v1123_v56 }
 0x350   : > { %v1505_v6 = vsel %vm1500_vm2, %v1346_v57, 0  ;;  %v1551_v7 = vsel %vm1500_vm2, %v1347_v58, 0  ;;  %v1597_v28 = vsel %vm1500_vm2, %v1348_v22, 0  ;;  %v1643_v29 = vsel %vm1500_vm2, %v1349_v23, 0 }
 0x351   : > { %v1135_v8 = vrot.slane %v1128_v61, %v3965_v63  ;;  %v1143_v10 = vrot.slane %v2738_v62, %v3965_v63  ;;  %v1151_v11 = vrot.slane %v1144_v1, %v3965_v63  ;;  %v1159_v12 = vrot.slane %v2739_v4, %v3965_v63  ;;  %2855 = vmatpush3.bf16.xpose.msra.mxu0 %v1505_v6 }
 0x352   : > { %2861 = vmatpush3.bf16.xpose.msra.mxu1 %v1551_v7  ;;  %2866 = vmatprep.subr.bf16.mxu0 %v3481_v2 }
 0x353   : > { %v1160_v0 = vcombine.low %v1135_v8, %v1143_v10  ;;  %v1176_v13 = vcombine.low %v1151_v11, %v1159_v12  ;;  %2872 = vmatprep.subr.bf16.mxu1 %v3481_v2  ;;  %v1161_v16 = vcombine.high %v1135_v8, %v1143_v10  ;;  %v1177_v17 = vcombine.high %v1151_v11, %v1159_v12 }
 0x355   : > { %v1168_v18 = vrot.slane %v1160_v0, %v3967_v9  ;;  %v1184_v19 = vrot.slane %v1176_v13, %v3967_v9  ;;  %v1175_v26 = vrot.slane %v1161_v16, %v3967_v9  ;;  %v1191_v27 = vrot.slane %v1177_v17, %v3967_v9 }
 0x357   : > { %v1192_v20 = vcombine.low %v1168_v18, %v1184_v19  ;;  %v1193_v21 = vcombine.high %v1168_v18, %v1184_v19  ;;  %v1194_v30 = vcombine.low %v1175_v26, %v1191_v27  ;;  %v1195_v31 = vcombine.high %v1175_v26, %v1191_v27 }
 0x359   : > { %v1196_v24 = vpack.c.bf16 %v1192_v20, %v1192_v20  ;;  %v1197_v25 = vpack.c.bf16 %v1193_v21, %v1193_v21  ;;  %v1198_v32 = vpack.c.bf16 %v1194_v30, %v1194_v30  ;;  %v1199_v33 = vpack.c.bf16 %v1195_v31, %v1195_v31 }
 0x35b   : > { %2857 = vmatmul.mubr.msk.bf16.vlgmr.msra.gmra.mxu0 %vm1500_vm2, %v1196_v24  ;;  %2863 = vmatmul.mubr.msk.bf16.vlgmr.msra.gmra.mxu1 %vm1500_vm2, %v1197_v25 }
 0x35c   : > { %2867 = vmatpush3.bf16.xpose.msra.mxu0 %v1597_v28  ;;  %2873 = vmatpush3.bf16.xpose.msra.mxu1 %v1643_v29 }
 0x35d   : > { %2868 = vmatprep.mubr.msk.bf16.mxu0 %vm3483_vm1, %v3481_v2  ;;  %2874 = vmatprep.mubr.msk.bf16.mxu1 %vm3483_vm1, %v3481_v2 }
 0x35e   : > { %2878 = vmatprep.subr.bf16.mxu0 %v3481_v2  ;;  %2884 = vmatprep.subr.bf16.mxu1 %v3481_v2 }
 0x363   : > { %2869 = vmatmul.mubr.msk.bf16.vlgmr.msra.gmra.mxu0 %vm1500_vm2, %v1198_v32  ;;  %2875 = vmatmul.mubr.msk.bf16.vlgmr.msra.gmra.mxu1 %vm1500_vm2, %v1199_v33 }
 0x364   : > { %2880 = vmatprep.mubr.msk.bf16.mxu0 %vm3483_vm1, %v3481_v2  ;;  %2886 = vmatprep.mubr.msk.bf16.mxu1 %vm3483_vm1, %v3481_v2 }
 0x41b   : > { %v1541_v34 = vpop.f32.mrf.mxu0  ;;  %v1587_v35 = vpop.f32.mrf.mxu1 }
 0x41c   : > { %v1688_v36 = vsel %vm1500_vm2, %v1587_v35, -inf  ;;  %v1685_v37 = vsel %vm1500_vm2, %v1541_v34, -inf }
 0x41d   : > { %1689 = vmax.xlane.f32.xlu0 %v1688_v36  ;;  %v2864_v38 = vpop.f32.mrf.mxu1  ;;  %1686 = vmax.xlane.f32.xlu1 %v1685_v37  ;;  %v2858_v39 = vpop.f32.mrf.mxu0 }
 0x41f   : > { %v1544_v40 = vpop.f32.mrf.mxu0  ;;  %v1590_v41 = vpop.f32.mrf.mxu1 }
 0x421   : > { %v2859_v42 = vpop.f32.mrf.mxu0  ;;  %v2865_v43 = vpop.f32.mrf.mxu1 }
 0x423   : > { %v1633_v44 = vpop.f32.mrf.mxu0  ;;  %v1679_v45 = vpop.f32.mrf.mxu1 }
 0x424   : > { %v1691_v46 = vsel %vm1500_vm2, %v1633_v44, -inf  ;;  %v1694_v52 = vsel %vm1500_vm2, %v1679_v45, -inf }
 0x425   : > { %v2876_v48 = vpop.f32.mrf.mxu1  ;;  %1692 = vmax.xlane.f32.xlu1 %v1691_v46  ;;  %v2870_v49 = vpop.f32.mrf.mxu0 }
 0x427   : > { %v1636_v50 = vpop.f32.mrf.mxu0  ;;  %v1682_v51 = vpop.f32.mrf.mxu1 }
 0x429   : > { %v2877_v53 = vpop.f32.mrf.mxu1  ;;  %1695 = vmax.xlane.f32.xlu1 %v1694_v52  ;;  %v2871_v54 = vpop.f32.mrf.mxu0 }
 0x43a   : > { %1354 = vrot.lane.b32.xlu1 %v3953_v47, %s3486_s30 }
 0x4a6   : > { %v1690_v55 = vpop.xlane.xlu0 %1689  ;;  %v1687_v56 = vpop.xlane.xlu1 %1686 }
 0x4a7   : > { %v1698_v57 = vsub.f32 %v1587_v35, %v1690_v55  ;;  %v1697_v58 = vsub.f32 %v1541_v34, %v1687_v56 }
 0x4a9   : > { %v1703_v59 = vmul.f32 1.442695, %v1698_v57  ;;  %v1701_v60 = vmul.f32 1.442695, %v1697_v58 }
 0x4ab   : > { %3147 = vpow2.f32 %v1703_v59 }
 0x4ac   : > { %3149 = vpow2.f32 %v1701_v60 }
 0x4ae   : > { %v1693_v6 = vpop.xlane.xlu1 %1692 }
 0x4af   : > { %v1699_v10 = vsub.f32 %v1633_v44, %v1693_v6 }
 0x4b1   : > { %v1705_v12 = vmul.f32 1.442695, %v1699_v10 }
 0x4b2   : > { %v1696_v7 = vpop.xlane.xlu1 %1695 }
 0x4b3   : > { %v1700_v8 = vsub.f32 %v1679_v45, %v1696_v7 }
 0x4b5   : > { %v1707_v11 = vmul.f32 1.442695, %v1700_v8 }
 0x4b6   : > { %v1355_v16 = vpop.permute.xlu1 %1354 }
 0x4b7   : > { %3151 = vpow2.f32 %v1707_v11  ;;  %v1360_v19 = vcombine.low %v3953_v47, %v1355_v16  ;;  %v1361_v20 = vcombine.high %v3953_v47, %v1355_v16 }
 0x4b8   : > { %v4029_v61 = vpop.eup %3147  ;;  %3153 = vpow2.f32 %v1705_v12 }
 0x4b9   : > { %v4031_v62 = vpop.eup %3149  ;;  %v1712_v1 = vsel %vm1500_vm2, %v4029_v61, 0.0  ;;  %v1368_v25 = vrot.slane %v1360_v19, %v3965_v63  ;;  %v1375_v26 = vrot.slane %v1361_v20, %v3965_v63 }
 0x4ba   : > { %v1709_v4 = vsel %vm1500_vm2, %v4031_v62, 0.0  ;;  %1713 = vadd.xlane.f32.xlu1 %v1712_v1 }
 0x4bb   : > { %1710 = vadd.xlane.f32.xlu0 %v1709_v4 }
 0x4c4   : > { %v4041_v0 = vpop.eup %3151 }
 0x4c5   : > { %v4043_v13 = vpop.eup %3153  ;;  %v1718_v14 = vsel %vm1500_vm2, %v4041_v0, 0.0 }
 0x4c6   : > { %v1715_v15 = vsel %vm1500_vm2, %v4043_v13, 0.0 }
 0x4cb   : > { %1357 = vrot.lane.b32.xlu1 %v3953_v47, %s3484_s10 }
 0x4d1   : > { %1351 = vrot.lane.b32.xlu0 %v3953_v47, %s3485_s15 }
 0x4ef   : > { %1719 = vadd.xlane.f32.xlu1 %v1718_v14 }
 0x4f0   : > { %1716 = vadd.xlane.f32.xlu0 %v1715_v15 }
 0x543   : > { %v1714_v17 = vpop.xlane.xlu1 %1713 }
 0x544   : > { %v1711_v18 = vpop.xlane.xlu0 %1710  ;;  %3155 = vrcp.f32 %v1714_v17 }
 0x545   : > { %3157 = vrcp.f32 %v1711_v18 }
 0x547   : > { %v1358_v21 = vpop.permute.xlu1 %1357 }
 0x548   : > { %v1352_v22 = vpop.permute.xlu0 %1351 }
 0x549   : > { %v1376_v23 = vcombine.low %v1352_v22, %v1358_v21  ;;  %v1377_v24 = vcombine.high %v1352_v22, %v1358_v21  ;;  %v3127_v22 = vld [vmem:[%s4343_s28 + $0x8] sm:$0xff]  }
 0x54b   : > { %v1384_v27 = vrot.slane %v1376_v23, %v3965_v63  ;;  %v1391_v28 = vrot.slane %v1377_v24, %v3965_v63 }
 0x54d   : > { %v1392_v29 = vcombine.low %v1368_v25, %v1384_v27  ;;  %v1393_v30 = vcombine.high %v1368_v25, %v1384_v27  ;;  %v1408_v31 = vcombine.low %v1375_v26, %v1391_v28  ;;  %v1409_v32 = vcombine.high %v1375_v26, %v1391_v28 }
 0x54f   : > { %v1400_v47 = vrot.slane %v1392_v29, %v3967_v9  ;;  %v1407_v33 = vrot.slane %v1393_v30, %v3967_v9  ;;  %v1416_v34 = vrot.slane %v1408_v31, %v3967_v9  ;;  %v1423_v35 = vrot.slane %v1409_v32, %v3967_v9 }
 0x551   : > { %v1428_v36 = vcombine.low %v1400_v47, %v1407_v33  ;;  %v2742_v37 = vcombine.high %v1400_v47, %v1407_v33  ;;  %v1444_v38 = vcombine.low %v1416_v34, %v1423_v35  ;;  %v2743_v39 = vcombine.high %v1416_v34, %v1423_v35  ;;  %v3156_v49 = vpop.eup %3155 }
 0x552   : > { %v3158_v54 = vpop.eup %3157  ;;  %v1726_v4 = vmul.f32 %v3156_v49, %v4029_v61  ;;  %v3128_v49 = vld [vmem:[%s4344_s0] sm:$0xff]  }
 0x553   : > { %v1435_v40 = vrot.slane %v1428_v36, %v3965_v63  ;;  %v1443_v41 = vrot.slane %v2742_v37, %v3965_v63  ;;  %v1451_v42 = vrot.slane %v1444_v38, %v3965_v63  ;;  %v1459_v43 = vrot.slane %v2743_v39, %v3965_v63 }
 0x554   : > { %v1725_v1 = vmul.f32 %v3158_v54, %v4031_v62  ;;  %v1730_v12 = vpack.c.bf16 %v1726_v4, %v1726_v4 }
 0x555   : > { %v1460_v44 = vcombine.low %v1435_v40, %v1443_v41  ;;  %v1476_v45 = vcombine.low %v1451_v42, %v1459_v43  ;;  %v1461_v46 = vcombine.high %v1435_v40, %v1443_v41  ;;  %v1477_v48 = vcombine.high %v1451_v42, %v1459_v43 }
 0x556   : > { %v1729_v11 = vpack.c.bf16 %v1725_v1, %v1725_v1 }
 0x557   : > { %v1468_v50 = vrot.slane %v1460_v44, %v3967_v9  ;;  %v1484_v51 = vrot.slane %v1476_v45, %v3967_v9  ;;  %v1475_v52 = vrot.slane %v1461_v46, %v3967_v9  ;;  %v1491_v53 = vrot.slane %v1477_v48, %v3967_v9 }
 0x559   : > { %v1492_v55 = vcombine.low %v1468_v50, %v1484_v51  ;;  %v1493_v56 = vcombine.high %v1468_v50, %v1484_v51  ;;  %v1494_v57 = vcombine.low %v1475_v52, %v1491_v53  ;;  %v1495_v58 = vcombine.high %v1475_v52, %v1491_v53 }
 0x55b   : > { %v1496_v59 = vpack.c.bf16 %v1492_v55, %v1492_v55  ;;  %v1497_v60 = vpack.c.bf16 %v1493_v56, %v1493_v56  ;;  %v1498_v8 = vpack.c.bf16 %v1494_v57, %v1494_v57  ;;  %v1499_v10 = vpack.c.bf16 %v1495_v58, %v1495_v58 }
 0x55d   : > { %v1738_v6 = vsel %vm1736_vm3, %v1496_v59, 0  ;;  %v1784_v7 = vsel %vm1736_vm3, %v1497_v60, 0  ;;  %v1830_v61 = vsel %vm1736_vm3, %v1498_v8, 0  ;;  %v1876_v62 = vsel %vm1736_vm3, %v1499_v10, 0 }
 0x55e   : > { %2879 = vmatpush3.bf16.msra.mxu0 %v1738_v6  ;;  %2885 = vmatpush3.bf16.msra.mxu1 %v1784_v7 }
 0x55f   : > { %2890 = vmatprep.subr.bf16.mxu0 %v3481_v2  ;;  %2896 = vmatprep.subr.bf16.mxu1 %v3481_v2 }
 0x561   : > { %2881 = vmatmul.mubr.msk.bf16.vlgmr.msra.gmra.mxu0 %vm1500_vm2, %v1729_v11  ;;  %2887 = vmatmul.mubr.msk.bf16.vlgmr.msra.gmra.mxu1 %vm1500_vm2, %v1730_v12 }
 0x562   : > { %2891 = vmatpush3.bf16.msra.mxu0 %v1830_v61  ;;  %2897 = vmatpush3.bf16.msra.mxu1 %v1876_v62 }
 0x563   : > { %2892 = vmatprep.mubr.msk.bf16.mxu0 %vm3483_vm1, %v3481_v2  ;;  %2898 = vmatprep.mubr.msk.bf16.mxu1 %vm3483_vm1, %v3481_v2 }
 0x564   : > { %2902 = vmatprep.subr.bf16.mxu0 %v3481_v2  ;;  %2910 = vmatprep.subr.bf16.mxu1 %v3481_v2 }
 0x578   : > { %v1720_v14 = vpop.xlane.xlu1 %1719 }
 0x579   : > { %v1717_v15 = vpop.xlane.xlu0 %1716  ;;  %3159 = vrcp.f32 %v1720_v14 }
 0x57a   : > { %3161 = vrcp.f32 %v1717_v15 }
 0x586   : > { %v3160_v16 = vpop.eup %3159 }
 0x587   : > { %v3162_v17 = vpop.eup %3161  ;;  %v1728_v18 = vmul.f32 %v3160_v16, %v4041_v0 }
 0x588   : > { %v1727_v19 = vmul.f32 %v3162_v17, %v4043_v13 }
 0x589   : > { %v1732_v20 = vpack.c.bf16 %v1728_v18, %v1728_v18 }
 0x58a   : > { %v1731_v21 = vpack.c.bf16 %v1727_v19, %v1727_v19 }
 0x58b   : > { %2899 = vmatmul.mubr.msk.bf16.vlgmr.msra.gmra.mxu1 %vm1500_vm2, %v1732_v20 }
 0x58c   : > { %2893 = vmatmul.mubr.msk.bf16.vlgmr.msra.gmra.mxu0 %vm1500_vm2, %v1731_v21  ;;  %2926 = vmatprep.mubr.msk.bf16.mxu1 %vm3483_vm1, %v3481_v2 }
 0x58d   : > { %2906 = vmatprep.mubr.msk.bf16.mxu0 %vm3483_vm1, %v3481_v2  ;;  %2903 = vmatpush3.bf16.msra.mxu0 %v3127_v22  ;;  %v2754_v22 = vld [vmem:[%s4346_s24] ss:$0 sm:$0xff] }
 0x58e   : > { %2904 = vmatprep.subr.bf16.mxu0 %v3481_v2 }
 0x591   : > { %2905 = vmatpush3.bf16.msra.mxu0 %v3128_v49 }
 0x592   : > { %2930 = vmatprep.subr.bf16.mxu0 %v3481_v2 }
 0x621   : > { %v1774_v0 = vpop.f32.mrf.mxu0  ;;  %v1820_v23 = vpop.f32.mrf.mxu1 }
 0x623   : > { %v2882_v13 = vpop.f32.mrf.mxu0  ;;  %v2888_v24 = vpop.f32.mrf.mxu1 }
 0x625   : > { %v1777_v25 = vpop.f32.mrf.mxu0  ;;  %v1823_v26 = vpop.f32.mrf.mxu1 }
 0x627   : > { %v2883_v27 = vpop.f32.mrf.mxu0  ;;  %v2889_v28 = vpop.f32.mrf.mxu1 }
 0x628   : > { %v3129_v27 = vld [vmem:[%s3851_s12 + $0x38] sm:$0xff]   ;;  %v3130_v28 = vld [vmem:[%s3851_s12 + $0x30] sm:$0xff]  }
 0x629   : > { %2911 = vmatpush3.bf16.msra.mxu1 %v3129_v27 }
 0x62a   : > { %2912 = vmatprep.subr.bf16.mxu1 %v3481_v2 }
 0x62d   : > { %2913 = vmatpush3.bf16.msra.mxu1 %v3130_v28 }
 0x62e   : > { %2914 = vmatprep.subr.bf16.mxu1 %v3481_v2 }
 0x64b   : > { %v1912_v29 = vpop.f32.mrf.mxu1 }
 0x64c   : > { %v1866_v30 = vpop.f32.mrf.mxu0  ;;  %v1934_v31 = vcombine.low %v1820_v23, %v1912_v29  ;;  %v1935_v32 = vcombine.high %v1820_v23, %v1912_v29 }
 0x64d   : > { %v1918_v47 = vcombine.low %v1774_v0, %v1866_v30  ;;  %v1919_v33 = vcombine.high %v1774_v0, %v1866_v30  ;;  %v2900_v34 = vpop.f32.mrf.mxu1 }
 0x64e   : > { %v1942_v35 = vrot.slane %v1934_v31, %v3965_v63  ;;  %v1949_v36 = vrot.slane %v1935_v32, %v3965_v63  ;;  %v2894_v37 = vpop.f32.mrf.mxu0  ;;  %v3133_v34 = vld [vmem:[%s3851_s12 + $0x18] sm:$0xff]  }
 0x64f   : > { %v1926_v38 = vrot.slane %v1918_v47, %v3965_v63  ;;  %v1933_v39 = vrot.slane %v1919_v33, %v3965_v63  ;;  %v1915_v40 = vpop.f32.mrf.mxu1  ;;  %v3131_v47 = vld [vmem:[%s3851_s12 + $0x28] sm:$0xff]   ;;  %v3132_v33 = vld [vmem:[%s3851_s12 + $0x20] sm:$0xff]  }
 0x650   : > { %v1869_v41 = vpop.f32.mrf.mxu0  ;;  %2915 = vmatpush3.bf16.msra.mxu1 %v3131_v47  ;;  %v3136_v37 = vld [vmem:[%s3851_s12] sm:$0xff]  }
 0x651   : > { %v1950_v42 = vcombine.low %v1926_v38, %v1942_v35  ;;  %v1951_v43 = vcombine.high %v1926_v38, %v1942_v35  ;;  %v1966_v44 = vcombine.low %v1933_v39, %v1949_v36  ;;  %v1967_v45 = vcombine.high %v1933_v39, %v1949_v36  ;;  %v2901_v46 = vpop.f32.mrf.mxu1  ;;  %2916 = vmatprep.subr.bf16.mxu1 %v3481_v2  ;;  %v3134_v35 = vld [vmem:[%s3851_s12 + $0x10] sm:$0xff]   ;;  %v3135_v36 = vld [vmem:[%s3851_s12 + $0x8] sm:$0xff]   ;;  %v3137_v38 = vld [vmem:[%s3855_s4 + $0x38] sm:$0xff]  }
 0x652   : > { %v2895_v48 = vpop.f32.mrf.mxu0  ;;  %v3138_v39 = vld [vmem:[%s3855_s4 + $0x30] sm:$0xff]   ;;  %v2759_v46 = vld [vmem:[%s760_s8] ss:$0 sm:$0xff] }
 0x653   : > { %v1958_v50 = vrot.slane %v1950_v42, %v3967_v9  ;;  %v1965_v51 = vrot.slane %v1951_v43, %v3967_v9  ;;  %v1974_v52 = vrot.slane %v1966_v44, %v3967_v9  ;;  %v1981_v53 = vrot.slane %v1967_v45, %v3967_v9  ;;  %v2758_v44 = vld [vmem:[%s757_s13] ss:$0 sm:$0xff] }
 0x654   : > { %2917 = vmatpush3.bf16.msra.mxu1 %v3132_v33 }
 0x655   : > { %v1986_v54 = vcombine.low %v1958_v50, %v1965_v51  ;;  %v2752_v55 = vcombine.high %v1958_v50, %v1965_v51  ;;  %v2002_v56 = vcombine.low %v1974_v52, %v1981_v53  ;;  %v2753_v57 = vcombine.high %v1974_v52, %v1981_v53  ;;  %2918 = vmatprep.subr.bf16.mxu1 %v3481_v2  ;;  %v3139_v51 = vld [vmem:[%s3855_s4 + $0x28] sm:$0xff]   ;;  %v3140_v52 = vld [vmem:[%s3855_s4 + $0x20] sm:$0xff]   ;;  %v3141_v53 = vld [vmem:[%s3855_s4 + $0x18] sm:$0xff]  }
 0x657   : > { %v1993_v58 = vrot.slane %v1986_v54, %v3965_v63  ;;  %v2001_v59 = vrot.slane %v2752_v55, %v3965_v63  ;;  %v2009_v60 = vrot.slane %v2002_v56, %v3965_v63  ;;  %v2017_v1 = vrot.slane %v2753_v57, %v3965_v63  ;;  %v3142_v54 = vld [vmem:[%s3855_s4 + $0x10] sm:$0xff]   ;;  %v3143_v55 = vld [vmem:[%s3855_s4 + $0x8] sm:$0xff]   ;;  %v3144_v56 = vld [vmem:[%s3855_s4] sm:$0xff]  }
 0x658   : > { %2919 = vmatpush3.bf16.msra.mxu1 %v3133_v34  ;;  %v2760_v57 = vld [vmem:[%s763_s7] ss:$0 sm:$0xff]  ;;  %s4351_s7 = sld [smem:[#allocation23_spill]] }
 0x659   : > { %v2019_v4 = vcombine.high %v1993_v58, %v2001_v59  ;;  %v2035_v6 = vcombine.high %v2009_v60, %v2017_v1  ;;  %v2018_v7 = vcombine.low %v1993_v58, %v2001_v59  ;;  %v2034_v8 = vcombine.low %v2009_v60, %v2017_v1  ;;  %2920 = vmatprep.subr.bf16.mxu1 %v3481_v2 }
 0x65b   : > { %v2033_v10 = vrot.slane %v2019_v4, %v3967_v9  ;;  %v2049_v11 = vrot.slane %v2035_v6, %v3967_v9  ;;  %v2026_v12 = vrot.slane %v2018_v7, %v3967_v9  ;;  %v2042_v61 = vrot.slane %v2034_v8, %v3967_v9 }
 0x65c   : > { %2921 = vmatpush3.bf16.msra.mxu1 %v3134_v35 }
 0x65d   : > { %v2052_v62 = vcombine.low %v2033_v10, %v2049_v11  ;;  %v2051_v14 = vcombine.high %v2026_v12, %v2042_v61  ;;  %v2050_v15 = vcombine.low %v2026_v12, %v2042_v61  ;;  %v2053_v63 = vcombine.high %v2033_v10, %v2049_v11  ;;  %2922 = vmatprep.subr.bf16.mxu1 %v3481_v2  ;;  %v2769_v12 = vld [vmem:[%s766_s20] ss:$0 sm:$0xff] }
 0x65e   : > { %p2778_p1 = scmp.ne.s32.totalorder %s4351_s7, 1 }
 0x65f   : > { %2059 = vrot.lane.b32.xlu1 %v2052_v62, %s3489_s1  ;;  %2055 = vrot.lane.b32.xlu0 %v2051_v14, %s3490_s29  ;;  %s4352_s30 = sld [smem:[#allocation46_spill]] (!%p2778_p1) }
 0x660   : > { %2923 = vmatpush3.bf16.msra.mxu1 %v3135_v36  ;;  %s4353_s1 = sld [smem:[#allocation47_spill]] (!%p2778_p1) }
 0x661   : > { %2924 = vmatprep.subr.bf16.mxu1 %v3481_v2 }
 0x663   : > { %2063 = vrot.lane.b32.xlu0 %v2053_v63, %s3491_s19 }
 0x664   : > { %2925 = vmatpush3.bf16.msra.mxu1 %v3136_v37 }
 0x6d1   : > { %v2056_v16 = vpop.permute.xlu0 %2055  ;;  %v2060_v17 = vpop.permute.xlu1 %2059 }
 0x6d2   : > { %v2066_v18 = vsel %vm1500_vm2, %v2050_v15, %v2056_v16 }
 0x6d3   : > { %v2068_v9 = vsel %vm2067_vm4, %v2066_v18, %v2060_v17 }
 0x6d5   : > { %v2064_v19 = vpop.permute.xlu0 %2063 }
 0x6d6   : > { %v2070_v20 = vsel %vm2069_vm5, %v2068_v9, %v2064_v19 }
 0x6d7   : > { %v2071_v21 = vpack.c.bf16 %v2070_v20, %v2070_v20 }
 0x6d9   : > { %2907 = vmatmul.mubr.msk.bf16.vlgmr.msra.gmra.mxu0 %vm2095_vm6, %v2071_v21 }
 0x6da   : > { %2946 = vmatprep.mubr.msk.bf16.mxu0 %vm3483_vm1, %v3481_v2  ;;  %2931 = vmatpush3.bf16.msra.mxu0 %v3137_v38 }
 0x6db   : > { %2932 = vmatprep.subr.bf16.mxu0 %v3481_v2 }
 0x6de   : > { %2933 = vmatpush3.bf16.msra.mxu0 %v3138_v39 }
 0x6df   : > { %2934 = vmatprep.subr.bf16.mxu0 %v3481_v2 }
 0x6e2   : > { %2935 = vmatpush3.bf16.msra.mxu0 %v3139_v51 }
 0x6e3   : > { %2936 = vmatprep.subr.bf16.mxu0 %v3481_v2 }
 0x6e6   : > { %2937 = vmatpush3.bf16.msra.mxu0 %v3140_v52 }
 0x6e7   : > { %2938 = vmatprep.subr.bf16.mxu0 %v3481_v2 }
 0x6ea   : > { %2939 = vmatpush3.bf16.msra.mxu0 %v3141_v53 }
 0x6eb   : > { %2940 = vmatprep.subr.bf16.mxu0 %v3481_v2 }
 0x6ee   : > { %2941 = vmatpush3.bf16.msra.mxu0 %v3142_v54 }
 0x6ef   : > { %2942 = vmatprep.subr.bf16.mxu0 %v3481_v2 }
 0x6f2   : > { %2943 = vmatpush3.bf16.msra.mxu0 %v3143_v55 }
 0x6f3   : > { %2944 = vmatprep.subr.bf16.mxu0 %v3481_v2 }
 0x6f6   : > { %2945 = vmatpush3.bf16.msra.mxu0 %v3144_v56 }
 0x799   : > { %v2133_v0 = vpop.f32.mrf.mxu0 }
 0x79a   : > { %v2134_v23 = vadd.f32 %v2754_v22, %v2133_v0 }
 0x79b   : > { %v2908_v13 = vpop.f32.mrf.mxu0 }
 0x79c   : > { %v4122_v24 = vadd.f32 %v2134_v23, %v3899_v5 }
 0x79d   : > { %v2136_v25 = vpop.f32.mrf.mxu0 }
 0x79e   : > { %2142 = vadd.xlane.f32.xlu1 %v4122_v24 }
 0x79f   : > { %v2909_v26 = vpop.f32.mrf.mxu0 }
 0x827   : > { %v2143_v29 = vpop.xlane.xlu1 %2142 }
 0x828   : > { %v2144_v30 = vmul.f32 0.03125, %v2143_v29 }
 0x82a   : > { %v2145_v5 = vsub.f32 %v4122_v24, %v2144_v30 }
 0x82c   : > { %v2146_v31 = vmul.f32 %v3883_v3, %v2145_v5 }
 0x82e   : > { %v2147_v32 = vmul.f32 %v2146_v31, %v2146_v31 }
 0x830   : > { %2148 = vadd.xlane.f32.xlu0 %v2147_v32 }
 0x8b9   : > { %v2149_v40 = vpop.xlane.xlu0 %2148 }
 0x8ba   : > { %v2150_v41 = vmul.f32 0.03125, %v2149_v40 }
 0x8bc   : > { %v2151_v42 = vadd.f32 1e-05, %v2150_v41 }
 0x8be   : > { %3163 = vrsqrt.f32 %v2151_v42 }
 0x8cb   : > { %v3164_v43 = vpop.eup %3163 }
 0x8cc   : > { %v2153_v45 = vmul.f32 %v3164_v43, %v2146_v31 }
 0x8ce   : > { %v2160_v48 = vmul.f32 %v2758_v44, %v2153_v45 }
 0x8d0   : > { %v2167_v49 = vadd.f32 %v2759_v46, %v2160_v48 }
 0x8d2   : > { %v2168_v50 = vpack.c.bf16 %v2167_v49, %v2167_v49 }
 0x8d4   : > { %2927 = vmatmul.mubr.bf16.vlgmr.msra.gmra.mxu1 %v2168_v50 }
 0x994   : > { %v2274_v58 = vpop.f32.mrf.mxu1 }
 0x995   : > { %v2275_v59 = vadd.f32 %v2760_v57, %v2274_v58 }
 0x996   : > { %v2928_v60 = vpop.f32.mrf.mxu1 }
 0x997   : > { %v2281_v1 = vmul.f32 0.70710677, %v2275_v59  ;;  %v2280_v8 = vmul.f32 0.5, %v2275_v59 }
 0x998   : > { %v2277_v4 = vpop.f32.mrf.mxu1 }
 0x999   : > { %3165 = verf.f32 %v2281_v1 }
 0x99a   : > { %v2929_v6 = vpop.f32.mrf.mxu1 }
 0x9a6   : > { %v3166_v7 = vpop.eup %3165 }
 0x9a7   : > { %v2283_v10 = vadd.f32 1.0, %v3166_v7 }
 0x9a9   : > { %v2284_v11 = vmul.f32 %v2283_v10, %v2280_v8 }
 0x9ab   : > { %v2285_v2 = vpack.c.bf16 %v2284_v11, %v2284_v11 }
 0x9ad   : > { %2947 = vmatmul.mubr.bf16.vlgmr.msra.gmra.mxu0 %v2285_v2 }
 0xa6d   : > { %v2391_v61 = vpop.f32.mrf.mxu0 }
 0xa6e   : > { %v2392_v62 = vadd.f32 %v2769_v12, %v2391_v61 }
 0xa6f   : > { %v2948_v14 = vpop.f32.mrf.mxu0  ;;  %2402 = sbr.rel (%p2778_p1) target bundleno = 2985 (0xba9), region = 108 }
 0xa70   : > { %v2397_v15 = vadd.f32 %v2392_v62, %v4122_v24 }
 0xa71   : > { %v2394_v63 = vpop.f32.mrf.mxu0 }
 0xa72   : > { %2398 = vst [vmem:[#allocation2] sm:$0xff] %v2397_v15 }
 0xa73   : > { %v2949_v16 = vpop.f32.mrf.mxu0 }
 0xa74   : > { %2405 = vadd.xlane.f32.xlu0 %v2397_v15  ;;  %v2779_v13 = vld [vmem:[%s4352_s30] ss:$0 sm:$0xff] }
 0xa75   : > { %v2780_v25 = vld [vmem:[%s4353_s1] ss:$0 sm:$0xff] }
 0xafd   : > { %v2406_v17 = vpop.xlane.xlu0 %2405 }
 0xafe   : > { %v2407_v18 = vmul.f32 0.03125, %v2406_v17 }
 0xb00   : > { %v2408_v19 = vsub.f32 %v2397_v15, %v2407_v18 }
 0xb02   : > { %v2409_v9 = vmul.f32 %v3883_v3, %v2408_v19 }
 0xb04   : > { %v2410_v20 = vmul.f32 %v2409_v9, %v2409_v9 }
 0xb06   : > { %2411 = vadd.xlane.f32.xlu0 %v2410_v20 }
 0xb8f   : > { %v2412_v21 = vpop.xlane.xlu0 %2411 }
 0xb90   : > { %v2413_v22 = vmul.f32 0.03125, %v2412_v21 }
 0xb92   : > { %v2414_v0 = vadd.f32 1e-05, %v2413_v22 }
 0xb94   : > { %3167 = vrsqrt.f32 %v2414_v0 }
 0xba1   : > { %v3168_v23 = vpop.eup %3167 }
 0xba2   : > { %v2416_v24 = vmul.f32 %v3168_v23, %v2409_v9 }
 0xba4   : > { %v2423_v26 = vmul.f32 %v2779_v13, %v2416_v24 }
 0xba6   : > { %v2430_v27 = vadd.f32 %v2780_v25, %v2423_v26 }
 0xba8   : > { %2431 = vst [vmem:[%s3895_s18] sm:$0xff] %v2430_v27 }
 0xba9 PF: > { %s4354_s29 = sld [smem:[#allocation24_spill]]  ;;  %s2446_s11 = sshll.u32 %s3895_s18, 4  ;;  %s2447_s11 = int_to_ptr.vmem [resolvable:$true] %s2446_s11 }
 0xbaa   : > { %s4356_s24 = sld [smem:[#allocation48_spill]]  ;;  %s2433_s3 = scalar_lea.sflag [#allocation5], %s3818_s27 }
 0xbab   : > { %s3337_s21 = scalar_lea.vmem %s2447_s11, 128  ;;  %s3492_s26 = smov [#allocation14]  }
 0xbac   : > { %p3338_p10 = scmp.ne.s32.totalorder %s2447_s11, %s3337_s21  ;;  %s3341_s9 = sshll.u32 %s3492_s26, 4  ;;  %s3342_s9 = int_to_ptr.vmem [resolvable:$false] %s3341_s9 }
 0xbad   : > { %s3343_s8 = scalar_lea.vmem %s3342_s9, 256  ;;  %p3344_p6 = scmp.lt.s32.totalorder %s2447_s11, %s3342_s9 }
 0xbae   : > { %p3339_p12 = pnand %p3338_p10, %p3747_p0  ;;  %p3345_p4 = scmp.lt.s32.totalorder %s3343_s8, %s3337_s21 }
 0xbaf   : > { %s2782_s25 = sshll.u32 %s4354_s29, 7 }
 0xbb0   : > { %s2444_s12 = scalar_lea.hbm %s4356_s24, %s2782_s25  ;;  %p3340_p8 = pneg %p3339_p12 }
 0xbb1   : > { %p3346_p3 = por %p3345_p4, %p3344_p6 }
 0xbb3   : > { %p3347_p5 = pnand %p3346_p3, %p3340_p8 }
 0xbb5   : > { %3350 = shalt.err (!%p3347_p5)
}
 0xbb6   : > { %s3351_s13 = scalar_lea.hbm %s2444_s12, 128  ;;  %s3355_s5 = scalar_lea.hbm %s4356_s24, 256 }
 0xbb7   : > { %p3352_p11 = scmp.ne.s32.totalorder %s2444_s12, %s3351_s13  ;;  %p3356_p7 = scmp.lt.s32.totalorder %s2444_s12, %s4356_s24 }
 0xbb8   : > { %p3357_p9 = scmp.lt.s32.totalorder %s3355_s5, %s3351_s13 }
 0xbb9   : > { %p3353_p2 = pnand %p3352_p11, %p3747_p0 }
 0xbba   : > { %p3358_p1 = por %p3357_p9, %p3356_p7 }
 0xbbb   : > { %p3354_p13 = pneg %p3353_p2 }
 0xbbd   : > { %p3359_p10 = pnand %p3358_p1, %p3354_p13 }
 0xbbf   : > { %3362 = shalt.err (!%p3359_p10)
}
 0xbc0   : > { %2965 = dma.vmem_to_hbm [thread:$0]  (%p3747_p0), %s2447_s11, 128, %s2444_s12, %s2433_s3  }
 0xbc1 PF: > { %p2991_p12 = scmp.ge.s32.totalorder %s3469_s23, 2  ;;  %s2458_s15 = sand.u32 1, %s3441_s16  }
 0xbc2   : > { %p4357_p8 = scmp.ne.s32.totalorder %s4318_s2, 0  ;;  %s2459_s7 = scalar_lea.sflag [#allocation5], %s2458_s15 }
 0xbc4   : > { %p2987_p6 = pnand %p2991_p12, %p4357_p8 }
 0xbc6   : > { %p2988_p4 = pneg %p2987_p6 }
 0xbc8   : > { %3424 = dma.done.wait (%p2988_p4), %s2459_s7, 128  }
 0xbc9   : > { %3426 = vsyncadd (%p2988_p4), %s2459_s7, 4294967168  ;;  %s39_s23 = sadd.s32 1, %s3469_s23   ;;  %s4358_s29 = sld [smem:[#allocation20_spill]] }
 0xbca   : > { %p36_p3 = scmp.ge.s32.totalorder %s39_s23, 6   ;;  %s4359_s30 = sld [smem:[#allocation21_spill]] }
 0xbcb   : > { %s4360_s15 = sld [smem:[#allocation28_spill]]  ;;  %s4367_s16 = smov %s3445_s17 }
 0xbcc   : > { %s4361_s22 = sld [smem:[#allocation22_spill]] }
 0xbcd   : > { %s4362_s18 = sld [smem:[#allocation33_spill]] }
 0xbce   : > { %s4363_s19 = sld [smem:[#allocation25_spill]] }
 0xbcf   : > { %s4364_s20 = sld [smem:[#allocation26_spill]] }
 0xbd0   : > { %s4365_s21 = sld [smem:[#allocation27_spill]] }
 0xbd1   : > { %s4366_s28 = sld [smem:[#allocation30_spill]] }
 0xbd2   : > { %s4368_s17 = smov %s4361_s22 }
 0xbd3   :  { %38 = sbr.rel (!%p36_p3) target bundleno = 31 (0x1f), region = 208 }
 0xbd7   : > { %s4369_s22 = smov %s4366_s28 }
 0xbd8   :  { %2464 = vsyncpa [#allocation4], 1 }
 0xbd9   :  { %2466 = vsyncpa [#allocation4 + $0x1], 1 }
 0xbda   :  { %2467 = vsyncpa [#allocation7], 1 }
 0xbdb   :  { %2469 = vsyncpa [#allocation7 + $0x1], 1 }
 0xbdc   :  { %2470 = vsyncpa [#allocation10], 1 }
 0xbdd   :  { %2472 = vsyncpa [#allocation10 + $0x1], 1 }
 0xbde   :  { %2473 = vsyncpa [#allocation13], 1 }
 0xbdf   :  { %2475 = vsyncpa [#allocation13 + $0x1], 1 }
 0xbe0   :  { %2476 = vsyncpa [#allocation5], 1 }
 0xbe1   :  { %2478 = vsyncpa [#allocation5 + $0x1], 1 }

</bundles_post_ra>
